<compile_context>
chip_gen: v6e
topology: v6e:2x2x1
jax: 0.10.0
libtpu: 0.0.40
codegen_flags: <defaults>
</compile_context>

<pallas_src>
import functools

import jax
import jax.numpy as jnp
from jax.experimental import pallas as pl
from jax.experimental.pallas import tpu as pltpu

NUM_CLASSES = 6
CENTER_VARIANCE = 0.1   # cfg.MODEL.CENTER_VARIANCE
SIZE_VARIANCE = 0.2     # cfg.MODEL.SIZE_VARIANCE
LANE = 128


def _round_up(x, m):
    return ((x + m - 1) // m) * m


# ----------------------------------------------------------------------------
# Fused per-level kernel:
#   3x3 "SAME" conv (cls|reg heads fused along Cout) as ONE K=9*Cin matmul,
#   followed (decode=True) by per-anchor softmax + prior-box decode, all in
#   VMEM.  decode=False emits the raw cls logits / box deltas (training path).
# ----------------------------------------------------------------------------
def _ssd_level_kernel(x_ref, w_ref, b_ref, gmat_ref, smat_ref, prwh_ref,
                      prcxy_ref, out_a_ref, out_b_ref, *,
                      H, W, Cin, k, num_classes, decode, compute_dtype):
    # x_ref    : (H*W + 2W + 2, Cin) f32, spatially flattened, zero-padded
    #            W+1 rows at each end (tap (dy,dx) -> static row shift dy*W+dx)
    # w_ref    : (9*Cin, Cout_pad) compute_dtype, tap-major / channel-minor
    # b_ref    : (1, Cout_pad) f32
    # gmat_ref : (k*C, k*C) f32 block-diagonal ones (per-anchor class-group sum)
    # smat_ref : (4k, 4k)   f32 permutation swapping (cx,cy)<->(w,h) per anchor
    # prwh_ref : (M, 4k)    f32 prior [pw, ph, pw, ph] per anchor
    # prcxy_ref: (M, 4k)    f32 prior [pcx, pcy, pcx, pcy] per anchor
    # out_a_ref: (M, k*C)   scores (decode) or cls logits (training)
    # out_b_ref: (M, 4k)    corner boxes (decode) or box deltas (training)
    M = H * W
    kC = k * num_classes
    k4 = 4 * k

    # Hoisted horizontal boundary masks (vertical handled by the zero pad).
    col = jax.lax.broadcasted_iota(jnp.int32, (M, 1), 0) % W
    lmask = jnp.broadcast_to(col != 0, (M, Cin))
    rmask = jnp.broadcast_to(col != (W - 1), (M, Cin))

    # Gather the 9 shifted taps and do a single K=9*Cin MXU matmul.
    taps = []
    for dy in range(3):
        for dx in range(3):
            xs = x_ref[pl.ds(dy * W + dx, M), :]          # (M, Cin)
            if dx == 0:
                xs = jnp.where(lmask, xs, 0.0)
            elif dx == 2:
                xs = jnp.where(rmask, xs, 0.0)
            taps.append(xs)
    x9 = jnp.concatenate(taps, axis=-1).astype(compute_dtype)   # (M, 9*Cin)
    res = jnp.dot(x9, w_ref[...],
                  preferred_element_type=jnp.float32) + b_ref[...]
    # res: (M, Cout_pad) f32; valid cols [0:kC] = cls logits, [kC:kC+4k] = deltas.

    logits = res[:, :kC]
    loc = res[:, kC:kC + k4]

    if not decode:                       # training path: raw predictor outputs
        out_a_ref[...] = logits
        out_b_ref[...] = loc
        return

    # ---- softmax over classes, per anchor (lane groups of C) ----
    m = jnp.max(logits, axis=-1, keepdims=True)   # same constant for all groups
    e = jnp.exp(logits - m)                       # in a row -> softmax-invariant
    denom = jnp.dot(e, gmat_ref[...], preferred_element_type=jnp.float32)
    out_a_ref[...] = e * pl.reciprocal(denom, approx=True)

    # ---- box decode (convert_locations_to_boxes + center->corner) ----
    # loc columns per anchor: [dcx, dcy, dw, dh]; locS: [dw, dh, dcx, dcy].
    locS = jnp.dot(loc, smat_ref[...], preferred_element_type=jnp.float32)
    prwh = prwh_ref[...]
    prcxy = prcxy_ref[...]
    lo = (loc * CENTER_VARIANCE) * prwh + prcxy \
        - 0.5 * jnp.exp(locS * SIZE_VARIANCE) * prwh      # valid at cols%4 < 2
    hi = (locS * CENTER_VARIANCE) * prwh + prcxy \
        + 0.5 * jnp.exp(loc * SIZE_VARIANCE) * prwh       # valid at cols%4 >= 2
    cmod = jax.lax.broadcasted_iota(jnp.int32, (M, k4), 1) % 4
    out_b_ref[...] = jnp.where(cmod < 2, lo, hi)          # [x1, y1, x2, y2]


def pallas_ssd_level(x_flat_pad, lvl, num_classes, decode):
    N, Lp, Cin = x_flat_pad.shape
    H, W, k = lvl["H"], lvl["W"], lvl["k"]
    M = H * W
    kC = k * num_classes
    k4 = 4 * k
    w, b = lvl["w"], lvl["b"]
    gmat, smat = lvl["gmat"], lvl["smat"]
    prwh, prcxy = lvl["prwh"], lvl["prcxy"]
    cout_pad = w.shape[1]

    kernel = functools.partial(
        _ssd_level_kernel, H=H, W=W, Cin=Cin, k=k, num_classes=num_classes,
        decode=decode, compute_dtype=w.dtype)

    flops = 2 * N * M * (9 * Cin) * cout_pad + 2 * N * M * (kC * kC + k4 * k4)
    transc = N * M * (kC + 2 * k4)
    bytes_accessed = (4 * (x_flat_pad.size + N * M * (kC + k4))
                      + w.size * w.dtype.itemsize
                      + 4 * (b.size + gmat.size + smat.size
                             + prwh.size + prcxy.size))

    return pl.pallas_call(
        kernel,
        out_shape=(jax.ShapeDtypeStruct((N, M, kC), jnp.float32),
                   jax.ShapeDtypeStruct((N, M, k4), jnp.float32)),
        grid_spec=pltpu.PrefetchScalarGridSpec(
            num_scalar_prefetch=0,
            grid=(N,),
            in_specs=[
                pl.BlockSpec((None, Lp, Cin), lambda n: (n, 0, 0)),
                pl.BlockSpec(w.shape, lambda n: (0, 0)),      # resident
                pl.BlockSpec(b.shape, lambda n: (0, 0)),      # resident
                pl.BlockSpec(gmat.shape, lambda n: (0, 0)),   # resident
                pl.BlockSpec(smat.shape, lambda n: (0, 0)),   # resident
                pl.BlockSpec(prwh.shape, lambda n: (0, 0)),   # resident
                pl.BlockSpec(prcxy.shape, lambda n: (0, 0)),  # resident
            ],
            out_specs=(
                pl.BlockSpec((None, M, kC), lambda n: (n, 0, 0)),
                pl.BlockSpec((None, M, k4), lambda n: (n, 0, 0)),
            ),
        ),
        compiler_params=pltpu.CompilerParams(
            dimension_semantics=("parallel",)),
        cost_estimate=pl.CostEstimate(flops=flops, transcendentals=transc,
                                      bytes_accessed=bytes_accessed),
    )(x_flat_pad, w, b, gmat, smat, prwh, prcxy)


# ----------------------------------------------------------------------------
# Deterministic PriorBox-like generator (center form, normalized, clipped)
# TODO(synk): stand-in for PriorBox(cfg); the real SSD anchor config lives in cfg.
# ----------------------------------------------------------------------------
def make_priors(fm_sizes, boxes_per_location):
    per_level = []
    for (H, W), kk in zip(fm_sizes, boxes_per_location):
        ys = (jnp.arange(H, dtype=jnp.float32) + 0.5) / H
        xs = (jnp.arange(W, dtype=jnp.float32) + 0.5) / W
        cy, cx = jnp.meshgrid(ys, xs, indexing="ij")      # (H, W)
        sizes = 0.1 + 0.1 * jnp.arange(kk, dtype=jnp.float32)
        cx_b = jnp.broadcast_to(cx[..., None], (H, W, kk))
        cy_b = jnp.broadcast_to(cy[..., None], (H, W, kk))
        w_b = jnp.broadcast_to(sizes, (H, W, kk))
        h_b = jnp.broadcast_to(sizes, (H, W, kk))
        p = jnp.stack([cx_b, cy_b, w_b, h_b], axis=-1).reshape(H * W, kk, 4)
        per_level.append(jnp.clip(p, 0.0, 1.0))
    flat = jnp.concatenate([p.reshape(-1, 4) for p in per_level], axis=0)
    return per_level, flat


# ----------------------------------------------------------------------------
# SSDBoxHead equivalent
# ----------------------------------------------------------------------------
class SSDBoxHeadPallas:
    def __init__(self, in_channels, boxes_per_location, fm_sizes, num_classes,
                 key, compute_dtype=jnp.float32):
        self.num_classes = num_classes
        self.boxes_per_location = boxes_per_location
        self.fm_sizes = fm_sizes
        self.in_channels = in_channels
        self.compute_dtype = compute_dtype
        self.levels = []     # kernel-side params per level
        self.raw_params = [] # (w_fused_4d, b_fused) f32 for the pure-JAX reference
        priors_per_level, self.priors = make_priors(fm_sizes, boxes_per_location)

        ks = jax.random.split(key, 4 * len(fm_sizes))
        for i, ((H, W), k) in enumerate(zip(fm_sizes, boxes_per_location)):
            c_cls = k * num_classes
            c_reg = k * 4
            # conv weights stored as (3,3,Cin,Cout) (== torch (Cout,Cin,3,3)
            # transposed to HWIO).
            wc = 0.05 * jax.random.normal(ks[4 * i + 0], (3, 3, in_channels, c_cls), jnp.float32)
            bc = 0.01 * jax.random.normal(ks[4 * i + 1], (c_cls,), jnp.float32)
            wr = 0.05 * jax.random.normal(ks[4 * i + 2], (3, 3, in_channels, c_reg), jnp.float32)
            br = 0.01 * jax.random.normal(ks[4 * i + 3], (c_reg,), jnp.float32)
            # Fuse cls|reg along Cout and zero-pad Cout to a 128-lane tile.
            w_fused = jnp.concatenate([wc, wr], axis=-1)          # (3,3,Cin,cout)
            b_fused = jnp.concatenate([bc, br], axis=0)
            cout = c_cls + c_reg
            cout_pad = _round_up(cout, LANE)
            w_kernel = jnp.pad(w_fused, ((0, 0), (0, 0), (0, 0), (0, cout_pad - cout)))
            w_kernel = w_kernel.reshape(9 * in_channels, cout_pad).astype(compute_dtype)
            b_kernel = jnp.pad(b_fused, (0, cout_pad - cout)).reshape(1, cout_pad)

            # Block-diagonal group-sum matrix (per-anchor softmax denominator).
            grp = jnp.arange(c_cls) // num_classes
            gmat = (grp[:, None] == grp[None, :]).astype(jnp.float32)
            # Swap-halves permutation within each anchor's 4 box columns.
            idx = jnp.arange(c_reg)
            partner = (idx // 4) * 4 + ((idx % 4) + 2) % 4
            smat = (jnp.arange(c_reg)[:, None] == partner[None, :]).astype(jnp.float32)
            # Priors pre-arranged in the reg-slab column layout.
            p = priors_per_level[i]                                # (H*W, k, 4)
            prwh = p[:, :, jnp.array([2, 3, 2, 3])].reshape(H * W, c_reg)
            prcxy = p[:, :, jnp.array([0, 1, 0, 1])].reshape(H * W, c_reg)

            self.levels.append(dict(H=H, W=W, k=k, w=w_kernel, b=b_kernel,
                                    gmat=gmat, smat=smat, prwh=prwh, prcxy=prcxy))
            self.raw_params.append((w_fused, b_fused))

    def _run_levels(self, features, decode):
        out_a, out_b = [], []
        for feat, lvl in zip(features, self.levels):
            x = jnp.transpose(feat, (0, 2, 3, 1))                 # NCHW -> NHWC
            N, H, W, Cin = x.shape
            x_flat = x.reshape(N, H * W, Cin)
            # Zero-pad W+1 rows at each end so tap (dy,dx) of the 3x3/pad-1
            # conv becomes a static row shift of dy*W + dx.
            x_flat_pad = jnp.pad(x_flat, ((0, 0), (W + 1, W + 1), (0, 0)))
            a, b = pallas_ssd_level(x_flat_pad, lvl, self.num_classes, decode)
            k = lvl["k"]
            out_a.append(a.reshape(N, H * W * k, self.num_classes))   # free reshape
            out_b.append(b.reshape(N, H * W * k, 4))
        return jnp.concatenate(out_a, axis=1), jnp.concatenate(out_b, axis=1)

    def forward(self, features, targets=None, training=False):
        if training:
            # _forward_train returns the raw detections tuple
            cls_logits, bbox_pred = self._run_levels(features, decode=False)
            return (cls_logits, bbox_pred)
        scores, boxes = self._run_levels(features, decode=True)
        # TODO(synk): PostProcessor / NMS (and the ONNX nms_TRT path) are
        # data-dependent variable-length ops with no clean Pallas equivalent.
        detections = (scores, boxes)
        return detections, {}


# ----------------------------------------------------------------------------
# Pure-JAX reference (same math path as the PyTorch module) for validation
# ----------------------------------------------------------------------------
def reference_forward(head, features):
    cls_list, reg_list = [], []
    for feat, (w4d, b), k in zip(features, head.raw_params, head.boxes_per_location):
        x = jnp.transpose(feat, (0, 2, 3, 1))
        out = jax.lax.conv_general_dilated(
            x, w4d, window_strides=(1, 1), padding="SAME",
            dimension_numbers=("NHWC", "HWIO", "NHWC"),
            precision=jax.lax.Precision.HIGHEST) + b
        N, H, W, _ = x.shape
        c_cls = k * head.num_classes
        cls_list.append(out[..., :c_cls].reshape(N, H * W * k, head.num_classes))
        reg_list.append(out[..., c_cls:].reshape(N, H * W * k, 4))
    cls_logits = jnp.concatenate(cls_list, axis=1)
    bbox_pred = jnp.concatenate(reg_list, axis=1)
    scores = jax.nn.softmax(cls_logits, axis=2)
    pr = head.priors[None]
    cxcy = bbox_pred[..., :2] * CENTER_VARIANCE * pr[..., 2:] + pr[..., :2]
    wh = jnp.exp(bbox_pred[..., 2:] * SIZE_VARIANCE) * pr[..., 2:]
    boxes = jnp.concatenate([cxcy - wh * 0.5, cxcy + wh * 0.5], axis=-1)
    return scores, boxes, cls_logits, bbox_pred


if __name__ == "__main__":
    key = jax.random.PRNGKey(0)
    k_f0, k_f1, k_w = jax.random.split(key, 3)

    N, CIN = 2, 16
    fm_sizes = [(8, 8), (4, 4)]
    boxes_per_loc = [4, 6]

    features = [
        jax.random.normal(k_f0, (N, CIN, 8, 8), jnp.float32),
        jax.random.normal(k_f1, (N, CIN, 4, 4), jnp.float32),
    ]

    head = SSDBoxHeadPallas(CIN, boxes_per_loc, fm_sizes, NUM_CLASSES, k_w)

    # Test path: conv + softmax + box decode fused per level.
    (scores, boxes), losses = head.forward(features)
    jax.block_until_ready((scores, boxes))

    total_priors = sum(h * w * k for (h, w), k in zip(fm_sizes, boxes_per_loc))
    assert scores.shape == (N, total_priors, NUM_CLASSES)
    assert boxes.shape == (N, total_priors, 4)
    assert bool(jnp.all(jnp.isfinite(scores))) and bool(jnp.all(jnp.isfinite(boxes)))

    scores_ref, boxes_ref, cls_ref, reg_ref = reference_forward(head, features)
    assert jnp.allclose(scores, scores_ref, atol=1e-2, rtol=1e-2), \
        float(jnp.max(jnp.abs(scores - scores_ref)))
    assert jnp.allclose(boxes, boxes_ref, atol=5e-3, rtol=5e-3), \
        float(jnp.max(jnp.abs(boxes - boxes_ref)))

    # Training path: raw cls logits / box deltas from the same kernel.
    cls_logits, bbox_pred = head.forward(features, training=True)
    jax.block_until_ready((cls_logits, bbox_pred))
    assert cls_logits.shape == (N, total_priors, NUM_CLASSES)
    assert bbox_pred.shape == (N, total_priors, 4)
    assert jnp.allclose(cls_logits, cls_ref, atol=5e-3, rtol=5e-3), \
        float(jnp.max(jnp.abs(cls_logits - cls_ref)))
    assert jnp.allclose(bbox_pred, reg_ref, atol=5e-3, rtol=5e-3), \
        float(jnp.max(jnp.abs(bbox_pred - reg_ref)))

    # Optional bf16 MXU path (same weights, f32 accumulation) — item 7.
    head_bf16 = SSDBoxHeadPallas(CIN, boxes_per_loc, fm_sizes, NUM_CLASSES, k_w,
                                 compute_dtype=jnp.bfloat16)
    (scores16, boxes16), _ = head_bf16.forward(features)
    jax.block_until_ready((scores16, boxes16))
    assert bool(jnp.all(jnp.isfinite(scores16))) and bool(jnp.all(jnp.isfinite(boxes16)))
    assert jnp.allclose(scores16, scores_ref, atol=2e-2, rtol=2e-2), \
        float(jnp.max(jnp.abs(scores16 - scores_ref)))
    assert jnp.allclose(boxes16, boxes_ref, atol=2e-2, rtol=2e-2), \
        float(jnp.max(jnp.abs(boxes16 - boxes_ref)))

    print("KERNEL_OK")
</pallas_src>

<mosaic_0001>
module attributes {stable_mosaic.version = 11 : i64} {
  func.func @_ssd_level_kernel(%arg0: i32, %arg1: memref<1x82x16xf32, #tpu.memory_space<vmem>>, %arg2: memref<144x128xf32, #tpu.memory_space<vmem>>, %arg3: memref<1x128xf32, #tpu.memory_space<vmem>>, %arg4: memref<24x24xf32, #tpu.memory_space<vmem>>, %arg5: memref<16x16xf32, #tpu.memory_space<vmem>>, %arg6: memref<64x16xf32, #tpu.memory_space<vmem>>, %arg7: memref<64x16xf32, #tpu.memory_space<vmem>>, %arg8: memref<1x64x24xf32, #tpu.memory_space<vmem>>, %arg9: memref<1x64x16xf32, #tpu.memory_space<vmem>>) attributes {dimension_semantics = [#tpu.dimension_semantics<parallel>], iteration_bounds = array<i64: 2>, scalar_prefetch = 0 : i64, scratch_operands = 0 : i64, tpu.core_type = #tpu.core_type<tc>, window_params = [{transform_indices = @transform_0, window_bounds = array<i64: 1, 82, 16>}, {pipeline_mode = #tpu.pipeline_mode<synchronous>, transform_indices = @transform_1, window_bounds = array<i64: 144, 128>}, {pipeline_mode = #tpu.pipeline_mode<synchronous>, transform_indices = @transform_2, window_bounds = array<i64: 1, 128>}, {pipeline_mode = #tpu.pipeline_mode<synchronous>, transform_indices = @transform_3, window_bounds = array<i64: 24, 24>}, {pipeline_mode = #tpu.pipeline_mode<synchronous>, transform_indices = @transform_4, window_bounds = array<i64: 16, 16>}, {pipeline_mode = #tpu.pipeline_mode<synchronous>, transform_indices = @transform_5, window_bounds = array<i64: 64, 16>}, {pipeline_mode = #tpu.pipeline_mode<synchronous>, transform_indices = @transform_6, window_bounds = array<i64: 64, 16>}, {transform_indices = @transform_7, window_bounds = array<i64: 1, 64, 24>}, {transform_indices = @transform_8, window_bounds = array<i64: 1, 64, 16>}]} {
    %0 = tpu.iota {dimensions = array<i32: 0>} : vector<64x1xi32>
    %c8_i32 = arith.constant 8 : i32
    %c0_i32 = arith.constant 0 : i32
    %1 = arith.cmpi eq, %c8_i32, %c0_i32 : i32
    %c1_i32 = arith.constant 1 : i32
    %2 = arith.select %1, %c1_i32, %c8_i32 : i32
    %3 = vector.broadcast %2 : i32 to vector<64x1xi32>
    %4 = arith.remsi %0, %3 : vector<64x1xi32>
    %c0_i32_0 = arith.constant 0 : i32
    %5 = vector.broadcast %c0_i32_0 : i32 to vector<64x1xi32>
    %6 = arith.cmpi ne, %4, %5 : vector<64x1xi32>
    %c0_i32_1 = arith.constant 0 : i32
    %7 = vector.broadcast %c0_i32_1 : i32 to vector<64x1xi32>
    %8 = arith.cmpi slt, %4, %7 : vector<64x1xi32>
    %c0_i32_2 = arith.constant 0 : i32
    %9 = arith.cmpi slt, %2, %c0_i32_2 : i32
    %10 = vector.broadcast %9 : i1 to vector<64x1xi1>
    %11 = vector.broadcast %10 : vector<64x1xi1> to vector<64x1xi1>
    %12 = arith.xori %8, %11 : vector<64x1xi1>
    %13 = arith.andi %12, %6 : vector<64x1xi1>
    %14 = vector.broadcast %2 : i32 to vector<64x1xi32>
    %15 = arith.addi %4, %14 : vector<64x1xi32>
    %16 = arith.select %13, %15, %4 : vector<64x1xi1>, vector<64x1xi32>
    %c0_i32_3 = arith.constant 0 : i32
    %17 = vector.broadcast %c0_i32_3 : i32 to vector<64x1xi32>
    %18 = arith.cmpi ne, %16, %17 : vector<64x1xi32>
    %19 = vector.shape_cast %18 : vector<64x1xi1> to vector<64x1xi1>
    %20 = vector.broadcast %19 : vector<64x1xi1> to vector<64x16xi1>
    %c7_i32 = arith.constant 7 : i32
    %21 = vector.broadcast %c7_i32 : i32 to vector<64x1xi32>
    %22 = arith.cmpi ne, %16, %21 : vector<64x1xi32>
    %23 = vector.shape_cast %22 : vector<64x1xi1> to vector<64x1xi1>
    %24 = vector.broadcast %23 : vector<64x1xi1> to vector<64x16xi1>
    %c0 = arith.constant 0 : index
    %c0_4 = arith.constant 0 : index
    %c0_5 = arith.constant 0 : index
    %25 = vector.load %arg1[%c0, %c0_4, %c0_5] : memref<1x82x16xf32, #tpu.memory_space<vmem>>, vector<1x64x16xf32>
    %26 = vector.shape_cast %25 : vector<1x64x16xf32> to vector<64x16xf32>
    %cst = arith.constant 0.000000e+00 : f32
    %27 = vector.broadcast %cst : f32 to vector<64x16xf32>
    %28 = arith.select %20, %26, %27 : vector<64x16xi1>, vector<64x16xf32>
    %c0_6 = arith.constant 0 : index
    %c1 = arith.constant 1 : index
    %c0_7 = arith.constant 0 : index
    %29 = vector.load %arg1[%c0_6, %c1, %c0_7] : memref<1x82x16xf32, #tpu.memory_space<vmem>>, vector<1x64x16xf32>
    %30 = vector.shape_cast %29 : vector<1x64x16xf32> to vector<64x16xf32>
    %c0_8 = arith.constant 0 : index
    %c2 = arith.constant 2 : index
    %c0_9 = arith.constant 0 : index
    %31 = vector.load %arg1[%c0_8, %c2, %c0_9] : memref<1x82x16xf32, #tpu.memory_space<vmem>>, vector<1x64x16xf32>
    %32 = vector.shape_cast %31 : vector<1x64x16xf32> to vector<64x16xf32>
    %cst_10 = arith.constant 0.000000e+00 : f32
    %33 = vector.broadcast %cst_10 : f32 to vector<64x16xf32>
    %34 = arith.select %24, %32, %33 : vector<64x16xi1>, vector<64x16xf32>
    %c0_11 = arith.constant 0 : index
    %c8 = arith.constant 8 : index
    %c0_12 = arith.constant 0 : index
    %35 = vector.load %arg1[%c0_11, %c8, %c0_12] : memref<1x82x16xf32, #tpu.memory_space<vmem>>, vector<1x64x16xf32>
    %36 = vector.shape_cast %35 : vector<1x64x16xf32> to vector<64x16xf32>
    %cst_13 = arith.constant 0.000000e+00 : f32
    %37 = vector.broadcast %cst_13 : f32 to vector<64x16xf32>
    %38 = arith.select %20, %36, %37 : vector<64x16xi1>, vector<64x16xf32>
    %c0_14 = arith.constant 0 : index
    %c9 = arith.constant 9 : index
    %c0_15 = arith.constant 0 : index
    %39 = vector.load %arg1[%c0_14, %c9, %c0_15] : memref<1x82x16xf32, #tpu.memory_space<vmem>>, vector<1x64x16xf32>
    %40 = vector.shape_cast %39 : vector<1x64x16xf32> to vector<64x16xf32>
    %c0_16 = arith.constant 0 : index
    %c10 = arith.constant 10 : index
    %c0_17 = arith.constant 0 : index
    %41 = vector.load %arg1[%c0_16, %c10, %c0_17] : memref<1x82x16xf32, #tpu.memory_space<vmem>>, vector<1x64x16xf32>
    %42 = vector.shape_cast %41 : vector<1x64x16xf32> to vector<64x16xf32>
    %cst_18 = arith.constant 0.000000e+00 : f32
    %43 = vector.broadcast %cst_18 : f32 to vector<64x16xf32>
    %44 = arith.select %24, %42, %43 : vector<64x16xi1>, vector<64x16xf32>
    %c0_19 = arith.constant 0 : index
    %c16 = arith.constant 16 : index
    %c0_20 = arith.constant 0 : index
    %45 = vector.load %arg1[%c0_19, %c16, %c0_20] : memref<1x82x16xf32, #tpu.memory_space<vmem>>, vector<1x64x16xf32>
    %46 = vector.shape_cast %45 : vector<1x64x16xf32> to vector<64x16xf32>
    %cst_21 = arith.constant 0.000000e+00 : f32
    %47 = vector.broadcast %cst_21 : f32 to vector<64x16xf32>
    %48 = arith.select %20, %46, %47 : vector<64x16xi1>, vector<64x16xf32>
    %c0_22 = arith.constant 0 : index
    %c17 = arith.constant 17 : index
    %c0_23 = arith.constant 0 : index
    %49 = vector.load %arg1[%c0_22, %c17, %c0_23] : memref<1x82x16xf32, #tpu.memory_space<vmem>>, vector<1x64x16xf32>
    %50 = vector.shape_cast %49 : vector<1x64x16xf32> to vector<64x16xf32>
    %c0_24 = arith.constant 0 : index
    %c18 = arith.constant 18 : index
    %c0_25 = arith.constant 0 : index
    %51 = vector.load %arg1[%c0_24, %c18, %c0_25] : memref<1x82x16xf32, #tpu.memory_space<vmem>>, vector<1x64x16xf32>
    %52 = vector.shape_cast %51 : vector<1x64x16xf32> to vector<64x16xf32>
    %cst_26 = arith.constant 0.000000e+00 : f32
    %53 = vector.broadcast %cst_26 : f32 to vector<64x16xf32>
    %54 = arith.select %24, %52, %53 : vector<64x16xi1>, vector<64x16xf32>
    %55 = tpu.concatenate %28, %30, %34, %38, %40, %44, %48, %50, %54 in 1 : vector<64x16xf32>, vector<64x16xf32>, vector<64x16xf32>, vector<64x16xf32>, vector<64x16xf32>, vector<64x16xf32>, vector<64x16xf32>, vector<64x16xf32>, vector<64x16xf32> -> vector<64x144xf32>
    %c0_27 = arith.constant 0 : index
    %c0_28 = arith.constant 0 : index
    %56 = vector.load %arg2[%c0_27, %c0_28] : memref<144x128xf32, #tpu.memory_space<vmem>>, vector<144x128xf32>
    %cst_29 = arith.constant dense<0.000000e+00> : vector<64x128xf32>
    %57 = tpu.matmul %55, %56, %cst_29 {dimension_numbers = #tpu.dot_dimension_numbers<[1], [0], [0], [1], [0, 0, 1, 1], [], []>} : vector<64x144xf32>, vector<144x128xf32>, vector<64x128xf32> -> vector<64x128xf32>
    %c0_30 = arith.constant 0 : index
    %c0_31 = arith.constant 0 : index
    %58 = vector.load %arg3[%c0_30, %c0_31] : memref<1x128xf32, #tpu.memory_space<vmem>>, vector<1x128xf32>
    %59 = vector.broadcast %58 : vector<1x128xf32> to vector<64x128xf32>
    %60 = arith.addf %57, %59 : vector<64x128xf32>
    %61 = vector.extract_strided_slice %60 {offsets = [0, 0], sizes = [64, 24], strides = [1, 1]} : vector<64x128xf32> to vector<64x24xf32>
    %62 = vector.extract_strided_slice %60 {offsets = [0, 24], sizes = [64, 16], strides = [1, 1]} : vector<64x128xf32> to vector<64x16xf32>
    %cst_32 = arith.constant dense<0xFF800000> : vector<64xf32>
    %63 = vector.multi_reduction <maximumf>, %61, %cst_32 [1] : vector<64x24xf32> to vector<64xf32>
    %64 = vector.shape_cast %63 : vector<64xf32> to vector<64x1xf32>
    %65 = vector.broadcast %64 : vector<64x1xf32> to vector<64x24xf32>
    %66 = arith.subf %61, %65 : vector<64x24xf32>
    %67 = math.exp %66 : vector<64x24xf32>
    %c0_33 = arith.constant 0 : index
    %c0_34 = arith.constant 0 : index
    %68 = vector.load %arg4[%c0_33, %c0_34] : memref<24x24xf32, #tpu.memory_space<vmem>>, vector<24x24xf32>
    %cst_35 = arith.constant dense<0.000000e+00> : vector<64x24xf32>
    %69 = tpu.matmul %67, %68, %cst_35 {dimension_numbers = #tpu.dot_dimension_numbers<[1], [0], [0], [1], [0, 0, 1, 1], [], []>} : vector<64x24xf32>, vector<24x24xf32>, vector<64x24xf32> -> vector<64x24xf32>
    %70 = tpu.reciprocal %69 {approx = true} : vector<64x24xf32> -> vector<64x24xf32>
    %71 = arith.mulf %67, %70 : vector<64x24xf32>
    %c0_36 = arith.constant 0 : index
    %c0_37 = arith.constant 0 : index
    %c0_38 = arith.constant 0 : index
    %72 = vector.load %arg8[%c0_36, %c0_37, %c0_38] : memref<1x64x24xf32, #tpu.memory_space<vmem>>, vector<1x64x24xf32>
    %73 = vector.shape_cast %72 : vector<1x64x24xf32> to vector<64x24xf32>
    %74 = vector.shape_cast %71 : vector<64x24xf32> to vector<1x64x24xf32>
    tpu.vector_store %arg8[%c0_36, %c0_37, %c0_38], %74 {strides = array<i32>} : memref<1x64x24xf32, #tpu.memory_space<vmem>>, vector<1x64x24xf32>,
    %c0_39 = arith.constant 0 : index
    %c0_40 = arith.constant 0 : index
    %75 = vector.load %arg5[%c0_39, %c0_40] : memref<16x16xf32, #tpu.memory_space<vmem>>, vector<16x16xf32>
    %cst_41 = arith.constant dense<0.000000e+00> : vector<64x16xf32>
    %76 = tpu.matmul %62, %75, %cst_41 {dimension_numbers = #tpu.dot_dimension_numbers<[1], [0], [0], [1], [0, 0, 1, 1], [], []>} : vector<64x16xf32>, vector<16x16xf32>, vector<64x16xf32> -> vector<64x16xf32>
    %c0_42 = arith.constant 0 : index
    %c0_43 = arith.constant 0 : index
    %77 = vector.load %arg6[%c0_42, %c0_43] : memref<64x16xf32, #tpu.memory_space<vmem>>, vector<64x16xf32>
    %c0_44 = arith.constant 0 : index
    %c0_45 = arith.constant 0 : index
    %78 = vector.load %arg7[%c0_44, %c0_45] : memref<64x16xf32, #tpu.memory_space<vmem>>, vector<64x16xf32>
    %cst_46 = arith.constant 1.000000e-01 : f32
    %79 = vector.broadcast %cst_46 : f32 to vector<64x16xf32>
    %80 = arith.mulf %62, %79 : vector<64x16xf32>
    %81 = arith.mulf %80, %77 : vector<64x16xf32>
    %82 = arith.addf %81, %78 : vector<64x16xf32>
    %cst_47 = arith.constant 2.000000e-01 : f32
    %83 = vector.broadcast %cst_47 : f32 to vector<64x16xf32>
    %84 = arith.mulf %76, %83 : vector<64x16xf32>
    %85 = math.exp %84 : vector<64x16xf32>
    %cst_48 = arith.constant 5.000000e-01 : f32
    %86 = vector.broadcast %cst_48 : f32 to vector<64x16xf32>
    %87 = arith.mulf %86, %85 : vector<64x16xf32>
    %88 = arith.mulf %87, %77 : vector<64x16xf32>
    %89 = arith.subf %82, %88 : vector<64x16xf32>
    %cst_49 = arith.constant 1.000000e-01 : f32
    %90 = vector.broadcast %cst_49 : f32 to vector<64x16xf32>
    %91 = arith.mulf %76, %90 : vector<64x16xf32>
    %92 = arith.mulf %91, %77 : vector<64x16xf32>
    %93 = arith.addf %92, %78 : vector<64x16xf32>
    %cst_50 = arith.constant 2.000000e-01 : f32
    %94 = vector.broadcast %cst_50 : f32 to vector<64x16xf32>
    %95 = arith.mulf %62, %94 : vector<64x16xf32>
    %96 = math.exp %95 : vector<64x16xf32>
    %cst_51 = arith.constant 5.000000e-01 : f32
    %97 = vector.broadcast %cst_51 : f32 to vector<64x16xf32>
    %98 = arith.mulf %97, %96 : vector<64x16xf32>
    %99 = arith.mulf %98, %77 : vector<64x16xf32>
    %100 = arith.addf %93, %99 : vector<64x16xf32>
    %101 = tpu.iota {dimensions = array<i32: 1>} : vector<64x16xi32>
    %c4_i32 = arith.constant 4 : i32
    %c0_i32_52 = arith.constant 0 : i32
    %102 = arith.cmpi eq, %c4_i32, %c0_i32_52 : i32
    %c1_i32_53 = arith.constant 1 : i32
    %103 = arith.select %102, %c1_i32_53, %c4_i32 : i32
    %104 = vector.broadcast %103 : i32 to vector<64x16xi32>
    %105 = arith.remsi %101, %104 : vector<64x16xi32>
    %c0_i32_54 = arith.constant 0 : i32
    %106 = vector.broadcast %c0_i32_54 : i32 to vector<64x16xi32>
    %107 = arith.cmpi ne, %105, %106 : vector<64x16xi32>
    %c0_i32_55 = arith.constant 0 : i32
    %108 = vector.broadcast %c0_i32_55 : i32 to vector<64x16xi32>
    %109 = arith.cmpi slt, %105, %108 : vector<64x16xi32>
    %c0_i32_56 = arith.constant 0 : i32
    %110 = arith.cmpi slt, %103, %c0_i32_56 : i32
    %111 = vector.broadcast %110 : i1 to vector<64x16xi1>
    %112 = vector.broadcast %111 : vector<64x16xi1> to vector<64x16xi1>
    %113 = arith.xori %109, %112 : vector<64x16xi1>
    %114 = arith.andi %113, %107 : vector<64x16xi1>
    %115 = vector.broadcast %103 : i32 to vector<64x16xi32>
    %116 = arith.addi %105, %115 : vector<64x16xi32>
    %117 = arith.select %114, %116, %105 : vector<64x16xi1>, vector<64x16xi32>
    %c2_i32 = arith.constant 2 : i32
    %118 = vector.broadcast %c2_i32 : i32 to vector<64x16xi32>
    %119 = arith.cmpi slt, %117, %118 : vector<64x16xi32>
    %120 = arith.select %119, %89, %100 : vector<64x16xi1>, vector<64x16xf32>
    %c0_57 = arith.constant 0 : index
    %c0_58 = arith.constant 0 : index
    %c0_59 = arith.constant 0 : index
    %121 = vector.load %arg9[%c0_57, %c0_58, %c0_59] : memref<1x64x16xf32, #tpu.memory_space<vmem>>, vector<1x64x16xf32>
    %122 = vector.shape_cast %121 : vector<1x64x16xf32> to vector<64x16xf32>
    %123 = vector.shape_cast %120 : vector<64x16xf32> to vector<1x64x16xf32>
    tpu.vector_store %arg9[%c0_57, %c0_58, %c0_59], %123 {strides = array<i32>} : memref<1x64x16xf32, #tpu.memory_space<vmem>>, vector<1x64x16xf32>,
    return
  }
  func.func @transform_0(%arg0: i32) -> (i32, i32, i32) {
    %c0_i32 = arith.constant 0 : i32
    %c0_i32_0 = arith.constant 0 : i32
    %c0_i32_1 = arith.constant 0 : i32
    return %arg0, %c0_i32, %c0_i32_0 : i32, i32, i32
  }
  func.func @transform_1(%arg0: i32) -> (i32, i32) {
    %c0_i32 = arith.constant 0 : i32
    %c0_i32_0 = arith.constant 0 : i32
    %c0_i32_1 = arith.constant 0 : i32
    return %c0_i32, %c0_i32_0 : i32, i32
  }
  func.func @transform_2(%arg0: i32) -> (i32, i32) {
    %c0_i32 = arith.constant 0 : i32
    %c0_i32_0 = arith.constant 0 : i32
    %c0_i32_1 = arith.constant 0 : i32
    return %c0_i32, %c0_i32_0 : i32, i32
  }
  func.func @transform_3(%arg0: i32) -> (i32, i32) {
    %c0_i32 = arith.constant 0 : i32
    %c0_i32_0 = arith.constant 0 : i32
    %c0_i32_1 = arith.constant 0 : i32
    return %c0_i32, %c0_i32_0 : i32, i32
  }
  func.func @transform_4(%arg0: i32) -> (i32, i32) {
    %c0_i32 = arith.constant 0 : i32
    %c0_i32_0 = arith.constant 0 : i32
    %c0_i32_1 = arith.constant 0 : i32
    return %c0_i32, %c0_i32_0 : i32, i32
  }
  func.func @transform_5(%arg0: i32) -> (i32, i32) {
    %c0_i32 = arith.constant 0 : i32
    %c0_i32_0 = arith.constant 0 : i32
    %c0_i32_1 = arith.constant 0 : i32
    return %c0_i32, %c0_i32_0 : i32, i32
  }
  func.func @transform_6(%arg0: i32) -> (i32, i32) {
    %c0_i32 = arith.constant 0 : i32
    %c0_i32_0 = arith.constant 0 : i32
    %c0_i32_1 = arith.constant 0 : i32
    return %c0_i32, %c0_i32_0 : i32, i32
  }
  func.func @transform_7(%arg0: i32) -> (i32, i32, i32) {
    %c0_i32 = arith.constant 0 : i32
    %c0_i32_0 = arith.constant 0 : i32
    %c0_i32_1 = arith.constant 0 : i32
    return %arg0, %c0_i32, %c0_i32_0 : i32, i32, i32
  }
  func.func @transform_8(%arg0: i32) -> (i32, i32, i32) {
    %c0_i32 = arith.constant 0 : i32
    %c0_i32_0 = arith.constant 0 : i32
    %c0_i32_1 = arith.constant 0 : i32
    return %arg0, %c0_i32, %c0_i32_0 : i32, i32, i32
  }
}

</mosaic_0001>

<bundles_post_ra>
// kernel: tpu_custom_call.1
= control target key start
LH: loop header
LB: loop body
LE: loop exit
PB: predicated region body
PF: predicated region fallthrough
CT: control target
= control target key end

     0   :  { %s2133_s27 = smov 0   ;;  %s3058_s0 = inlined_call_operand.vmem [shape: f32[2,82,16], index: 0, kind: input, shape index: {}]   ;;  %s3059_s1 = inlined_call_operand.vmem [shape: f32[144,128], index: 1, kind: input, shape index: {}]   ;;  %s3060_s2 = inlined_call_operand.vmem [shape: f32[1,128], index: 2, kind: input, shape index: {}]   ;;  %s3061_s3 = inlined_call_operand.vmem [shape: f32[24,24], index: 3, kind: input, shape index: {}]   ;;  %s3062_s4 = inlined_call_operand.vmem [shape: f32[16,16], index: 4, kind: input, shape index: {}]   ;;  %s3063_s5 = inlined_call_operand.vmem [shape: f32[64,16], index: 5, kind: input, shape index: {}]   ;;  %s3064_s6 = inlined_call_operand.vmem [shape: f32[64,16], index: 6, kind: input, shape index: {}]   ;;  %s3065_s7 = inlined_call_operand.vmem [shape: f32[2,64,24], index: 7, kind: output, shape index: {0}]   ;;  %s3066_s8 = inlined_call_operand.vmem [shape: f32[2,64,16], index: 8, kind: output, shape index: {1}]  }
   0x1 LB: > { %s1768_s28 = sadd.s32 4294967295, %s2076_s27   ;;  %p1772_p0 = scmp.ge.s32.totalorder %s2076_s27, 1  ;;  %s2076_s27 = sphi %s2133_s27, %s19_s27  }
   0x2   : > { %p265_p1 = scmp.lt.s32.totalorder %s2076_s27, 3 }
   0x4   : > { %p266_p2 = pnand %p1772_p0, %p265_p1 }
   0x5   : > { %p304_p3 = scmp.lt.s32.totalorder (!%p266_p2), %s1768_s28, 1  ;;  %s2079_s21 = smov (!%p266_p2), 16  }
   0x6   : > { %269 = sbr.rel (%p266_p2) target bundleno = 1014 (0x3f6), region = 48  ;;  %s2080_s22 = smov (!%p266_p2), 64  }
   0x7   : > { %s2081_s29 = smov (!%p266_p2), 32   ;;  %s2082_s30 = smov (!%p266_p2), 48  }
   0x8   : > { %s2083_s11 = smov (!%p266_p2), 80   ;;  %s2084_s12 = smov (!%p266_p2), 96  }
   0x9   : > { %s2085_s17 = smov (!%p266_p2), 112   ;;  %s2086_s9 = smov (!%p266_p2), 104  }
   0xa   : > { %s2087_s16 = smov (!%p266_p2), 24  }
   0xb   : > { %v319_v0 = vlaneseq  ;;  %v838_v1 = vld [vmem:[%s3059_s1 + $0x78] sm:$0xff]  ;;  %v2078_v2 = vmov 0.0   ;;  %v837_v3 = vld [vmem:[%s3059_s1 + $0x70] sm:$0xff]  ;;  %s3148_s28 = smov (!%p304_p3, %s1768_s28), 1  ;;  %v836_v5 = vld [vmem:[%s3059_s1 + $0x68] sm:$0xff]  ;;  %vm3067_vm8 = vcmask 130048  }
   0xc   : > { %872 = vmatprep.subr.mxu0 %v2078_v2  ;;  %s1862_s13 = smul.u32 88, %s3148_s28  ;;  %v835_v8 = vld [vmem:[%s3059_s1 + $0x60] sm:$0xff]  ;;  %v834_v12 = vld [vmem:[%s3059_s1 + $0x58] sm:$0xff]  ;;  %v833_v35 = vld [vmem:[%s3059_s1 + $0x50] sm:$0xff]  ;;  %s1805_s25 = sshll.u32 %s3148_s28, 6 }
   0xd   : > { %v2151_v4 = vshrl.u32 %v319_v0, 7  ;;  %873 = vmatpush1.msra.mxu0 %v838_v1  ;;  %v832_v42 = vld [vmem:[%s3059_s1 + $0x48] sm:$0xff]  ;;  %v831_v46 = vld [vmem:[%s3059_s1 + $0x40] sm:$0xff]  ;;  %v830_v55 = vld [vmem:[%s3059_s1 + $0x38] sm:$0xff]  ;;  %s3009_s14 = scalar_lea.vmem %s3066_s8, %s1805_s25 }
   0xe   : > { %874 = vmatprep.subr.mxu0 %v2078_v2  ;;  %s2167_s18 = scalar_lea.vmem %s3058_s0, %s1862_s13  ;;  %v829_v1 = vld [vmem:[%s3059_s1 + $0x30] sm:$0xff]  ;;  %s2885_s13 = scalar_lea.vmem %s3065_s7, %s1805_s25 }
   0xf   : > { %v321_v6 = vadd.s32 8, %v2151_v4  ;;  %v332_v7 = vand.u32 7, %v2151_v4  ;;  %875 = vmatpush1.msra.mxu0 %v837_v3  ;;  %v488_v13 = vld [vmem:[%s2167_s18 + $0x1] sm:$0xff]  ;;  %v489_v14 = vld [vmem:[%s2167_s18 + $0x9] sm:$0xff]  ;;  %v490_v15 = vld [vmem:[%s2167_s18 + $0x11] sm:$0xff]  ;;  %v322_v16 = vadd.s32 16, %v2151_v4 }
  0x10   : > { %876 = vmatprep.subr.mxu0 %v2078_v2  ;;  %v323_v17 = vadd.s32 24, %v2151_v4  ;;  %v1881_v18 = vpack.i.bf16 %v489_v14, %v488_v13  ;;  %v1886_v19 = vpack.i.bf16 %v490_v15, %v489_v14  ;;  %v496_v21 = vld [vmem:[%s2167_s18 + $0x2] sm:$0xff]  ;;  %v497_v22 = vld [vmem:[%s2167_s18 + $0xa] sm:$0xff]  ;;  %v2213_v30 = vld [vmem:[%s2167_s18 + $0x12] sm:$0xff]  ;;  %v324_v53 = vadd.s32 32, %v2151_v4 }
  0x11   : > { %v339_v9 = vand.u32 7, %v321_v6  ;;  %vm2169_vm0 = vcmp.ne.s32.totalorder %v332_v7, 7  ;;  %vm2173_vm1 = vcmp.ne.s32.totalorder %v332_v7, 0  ;;  %877 = vmatpush1.msra.mxu0 %v836_v5  ;;  %v2197_v24 = vld [vmem:[%s2167_s18 + $0x8] sm:$0xff]  ;;  %v2204_v27 = vld [vmem:[%s2167_s18 + $0x10] sm:$0xff]  ;;  %v2224_v34 = vld [vmem:[%s2167_s18 + $0x18] sm:$0xff] }
  0x12   : > { %878 = vmatprep.subr.mxu0 %v2078_v2  ;;  %v504_v25 = vsel %vm2169_vm0, %v496_v21, 0.0  ;;  %v513_v28 = vsel %vm2173_vm1, %v2197_v24, 0.0  ;;  %1882 = vrot.lane.b32.xlu0 %v1881_v18, %s2079_s21  ;;  %v523_v33 = vsel %vm2169_vm0, %v497_v22, 0.0  ;;  %v532_v38 = vsel %vm2173_vm1, %v2204_v27, 0.0  ;;  %v2245_v45 = vld [vmem:[%s2167_s18 + $0x19] sm:$0xff]  ;;  %v2294_v60 = vld [vmem:[%s2167_s18 + $0x22] sm:$0xff] }
  0x13   : > { %vm2186_vm2 = vcmp.ne.s32.totalorder %v339_v9, 7  ;;  %vm2192_vm3 = vcmp.ne.s32.totalorder %v339_v9, 0  ;;  %879 = vmatpush1.msra.mxu0 %v835_v8  ;;  %1887 = vrot.lane.b32.xlu1 %v1886_v19, %s2080_s22  ;;  %v346_v40 = vand.u32 7, %v322_v16  ;;  %v353_v41 = vand.u32 7, %v323_v17  ;;  %v2260_v49 = vld [vmem:[%s2167_s18 + $0x1a] sm:$0xff]  ;;  %v828_v17 = vld [vmem:[%s3059_s1 + $0x28] sm:$0xff] }
  0x14   : > { %v505_v26 = vsel %vm2186_vm2, %v497_v22, 0.0  ;;  %v481_v29 = vsel %vm2192_vm3, %v2197_v24, 0.0  ;;  %880 = vmatprep.subr.mxu0 %v2078_v2  ;;  %v514_v32 = vsel %vm2192_vm3, %v2204_v27, 0.0  ;;  %v524_v37 = vsel %vm2186_vm2, %v2213_v30, 0.0  ;;  %v2271_v52 = vld [vmem:[%s2167_s18 + $0x20] sm:$0xff] }
  0x15   : > { %v1891_v31 = vpack.i.bf16 %v505_v26, %v504_v25  ;;  %v1896_v36 = vpack.i.bf16 %v514_v32, %v513_v28  ;;  %v533_v39 = vsel %vm2192_vm3, %v2224_v34, 0.0  ;;  %881 = vmatpush1.msra.mxu0 %v834_v12  ;;  %v1901_v43 = vpack.i.bf16 %v524_v37, %v523_v33  ;;  %v2299_v62 = vld [vmem:[%s2167_s18] sm:$0xff]  ;;  %v493_v28 = vld [vmem:[%s2167_s18 + $0x29] sm:$0xff]  ;;  %v826_v37 = vld [vmem:[%s3059_s1 + $0x18] sm:$0xff] }
  0x16   : > { %882 = vmatprep.subr.mxu0 %v2078_v2  ;;  %v1911_v44 = vpack.i.bf16 %v533_v39, %v532_v38  ;;  %vm2251_vm4 = vcmp.ne.s32.totalorder %v346_v40, 7  ;;  %vm2255_vm5 = vcmp.ne.s32.totalorder %v353_v41, 7  ;;  %vm2262_vm6 = vcmp.ne.s32.totalorder %v346_v40, 0  ;;  %v492_v8 = vld [vmem:[%s2167_s18 + $0x21] sm:$0xff]  ;;  %v2366_v32 = vld [vmem:[%s2167_s18 + $0x2a] sm:$0xff] }
  0x17   : > { %883 = vmatpush1.msra.mxu0 %v833_v35  ;;  %1892 = vrot.lane.b32.xlu0 %v1891_v31, %s2081_s29  ;;  %vm2266_vm7 = vcmp.ne.s32.totalorder %v353_v41, 0  ;;  %v1906_v54 = vpack.i.bf16 %v2245_v45, %v490_v15  ;;  %v506_v56 = vsel %vm2251_vm4, %v2213_v30, 0.0  ;;  %v507_v57 = vsel %vm2255_vm5, %v2260_v49, 0.0  ;;  %v2327_v15 = vld [vmem:[%s2167_s18 + $0x28] sm:$0xff]  ;;  %v827_v22 = vld [vmem:[%s3059_s1 + $0x20] sm:$0xff] }
  0x18   : > { %1897 = vrot.lane.b32.xlu1 %v1896_v36, %s2082_s30  ;;  %884 = vmatprep.subr.mxu0 %v2078_v2  ;;  %v515_v58 = vsel %vm2262_vm6, %v2224_v34, 0.0  ;;  %v516_v59 = vsel %vm2266_vm7, %v2271_v52, 0.0  ;;  %v325_v61 = vadd.s32 40, %v2151_v4  ;;  %v360_v63 = vand.u32 7, %v324_v53 }
  0x19   : > { %885 = vmatpush1.msra.mxu0 %v832_v42  ;;  %v1921_v3 = vpack.i.bf16 %v507_v57, %v506_v56  ;;  %v1926_v5 = vpack.i.bf16 %v516_v59, %v515_v58  ;;  %v525_v6 = vsel %vm2251_vm4, %v2260_v49, 0.0  ;;  %v526_v7 = vsel %vm2255_vm5, %v2294_v60, 0.0  ;;  %v824_v56 = vld [vmem:[%s3059_s1 + $0x8] sm:$0xff]  ;;  %v494_v59 = vld [vmem:[%s2167_s18 + $0x31] sm:$0xff] }
  0x1a   : > { %886 = vmatprep.subr.mxu0 %v2078_v2  ;;  %v480_v9 = vsel %vm2173_vm1, %v2299_v62, 0.0  ;;  %v482_v12 = vsel %vm2262_vm6, %v2204_v27, 0.0  ;;  %v483_v13 = vsel %vm2266_vm7, %v2224_v34, 0.0  ;;  %v542_v14 = vsel %vm2169_vm0, %v2213_v30, 0.0 }
  0x1b   : > { %1902 = vrot.lane.b32.xlu0 %v1901_v43, %s2083_s11  ;;  %887 = vmatpush1.msra.mxu0 %v831_v46  ;;  %v367_v16 = vand.u32 7, %v325_v61  ;;  %v1931_v10 = vpack.i.bf16 %v492_v8, %v2245_v45  ;;  %v1936_v18 = vpack.i.bf16 %v526_v7, %v525_v6  ;;  %v2338_v19 = vadd.s32 48, %v2151_v4  ;;  %v2401_v45 = vld [vmem:[%s2167_s18 + $0x30] sm:$0xff] }
  0x1c   : > { %1912 = vrot.lane.b32.xlu1 %v1911_v44, %s2084_s12  ;;  %888 = vmatprep.subr.mxu0 %v2078_v2  ;;  %v2341_v21 = vadd.s32 56, %v2151_v4  ;;  %v534_v25 = vsel %vm2262_vm6, %v2271_v52, 0.0  ;;  %v535_v26 = vsel %vm2266_vm7, %v2327_v15, 0.0  ;;  %vm2353_vm9 = vcmp.ne.s32.totalorder %v360_v63, 7  ;;  %v2422_v61 = vld [vmem:[%s2167_s18 + $0x32] sm:$0xff] }
  0x1d   : > { %889 = vmatpush1.msra.mxu0 %v830_v55  ;;  %1779 = vmatprep.mubr.msk.f32.mxu0 %vm3067_vm8, %v542_v14  ;;  %vm2357_vm10 = vcmp.ne.s32.totalorder %v367_v16, 0  ;;  %vm2361_vm11 = vcmp.ne.s32.totalorder %v367_v16, 7  ;;  %vm2368_vm12 = vcmp.ne.s32.totalorder %v360_v63, 0  ;;  %v543_v35 = vsel %vm2186_vm2, %v2260_v49, 0.0  ;;  %v2425_v63 = vld [vmem:[%s2167_s18 + $0x38] sm:$0xff] }
  0x1e   : > { %890 = vmatprep.subr.mxu0 %v2078_v2  ;;  %v485_v36 = vsel %vm2357_vm10, %v2327_v15, 0.0  ;;  %v484_v38 = vsel %vm2368_vm12, %v2271_v52, 0.0  ;;  %v544_v39 = vsel %vm2251_vm4, %v2294_v60, 0.0  ;;  %v545_v40 = vsel %vm2255_vm5, %v2366_v32, 0.0 }
  0x1f   : > { %1907 = vrot.lane.b32.xlu0 %v1906_v54, %s2085_s17  ;;  %891 = vmatpush1.msra.mxu0 %v829_v1  ;;  %v1941_v41 = vpack.i.bf16 %v535_v26, %v534_v25  ;;  %v1946_v42 = vpack.i.bf16 %v493_v28, %v492_v8  ;;  %v508_v43 = vsel %vm2353_vm9, %v2294_v60, 0.0  ;;  %v509_v44 = vsel %vm2361_vm11, %v2366_v32, 0.0  ;;  %v2470_v26 = vld [vmem:[%s2167_s18 + $0x3a] sm:$0xff] }
  0x20   : > { %1917 = vrot.lane.b32.xlu1 %v1906_v54, %s2079_s21  ;;  %892 = vmatprep.subr.mxu0 %v2078_v2  ;;  %v374_v46 = vand.u32 7, %v2338_v19  ;;  %v381_v53 = vand.u32 7, %v2341_v21  ;;  %v825_v54 = vld [vmem:[%s3059_s1 + $0x10] sm:$0xff]  ;;  %v1956_v55 = vpack.i.bf16 %v509_v44, %v508_v43  ;;  %v517_v57 = vsel %vm2368_vm12, %v2327_v15, 0.0  ;;  %v840_v21 = vld [vmem:[%s3059_s1 + $0x88] sm:$0xff]  ;;  %v512_v44 = vld [vmem:[%s2167_s18 + $0x40] sm:$0xff] }
  0x21   : > { %893 = vmatpush1.msra.mxu0 %v828_v17  ;;  %v518_v58 = vsel %vm2357_vm10, %v2401_v45, 0.0  ;;  %v1966_v14 = vpack.i.bf16 %v494_v59, %v493_v28  ;;  %v527_v16 = vsel %vm2353_vm9, %v2366_v32, 0.0  ;;  %v528_v17 = vsel %vm2361_vm11, %v2422_v61, 0.0  ;;  %v839_v28 = vld [vmem:[%s3059_s1 + $0x80] sm:$0xff] }
  0x22   : > { %894 = vmatprep.subr.mxu0 %v2078_v2  ;;  %vm2427_vm13 = vcmp.ne.s32.totalorder %v374_v46, 0  ;;  %vm2431_vm14 = vcmp.ne.s32.totalorder %v381_v53, 0  ;;  %v1961_v8 = vpack.i.bf16 %v518_v58, %v517_v57  ;;  %v546_v19 = vsel %vm2353_vm9, %v2422_v61, 0.0 }
  0x23   : > { %1922 = vrot.lane.b32.xlu0 %v1921_v3, %s2081_s29  ;;  %895 = vmatpush1.msra.mxu0 %v827_v22  ;;  %v486_v6 = vsel %vm2427_vm13, %v2401_v45, 0.0  ;;  %v487_v7 = vsel %vm2431_vm14, %v2425_v63, 0.0  ;;  %v1971_v22 = vpack.i.bf16 %v528_v17, %v527_v16  ;;  %vm2479_vm15 = vcmp.ne.s32.totalorder %v374_v46, 7  ;;  %v2517_v16 = vld [vmem:[%s2167_s18 + $0x4a] sm:$0xff] }
  0x24   : > { %1927 = vrot.lane.b32.xlu1 %v1926_v5, %s2082_s30  ;;  %896 = vmatprep.subr.mxu0 %v2078_v2  ;;  %v823_v5 = vld [vmem:[%s3059_s1] sm:$0xff]  ;;  %vm2483_vm0 = vcmp.ne.s32.totalorder %v381_v53, 7  ;;  %v510_v46 = vsel %vm2479_vm15, %v2422_v61, 0.0  ;;  %vm769_vm8 = vcmask 261120   ;;  %vm805_vm3 = vcmask 785408  }
  0x25   : > { %897 = vmatpush1.msra.mxu0 %v826_v37  ;;  %v495_v37 = vld [vmem:[%s2167_s18 + $0x39] sm:$0xff]  ;;  %v511_v53 = vsel %vm2483_vm0, %v2470_v26, 0.0  ;;  %v549_v17 = vsel %vm2483_vm0, %v2517_v16, 0.0  ;;  %vm3112_vm6 = vcmask 392192  }
  0x26   : > { %898 = vmatprep.subr.mxu0 %v2078_v2  ;;  %v1991_v58 = vpack.i.bf16 %v511_v53, %v510_v46  ;;  %vm3113_vm7 = vmmov %vm3112_vm6 }
  0x27   : > { %1932 = vrot.lane.b32.xlu0 %v1931_v10, %s2080_s22  ;;  %899 = vmatpush1.msra.mxu0 %v825_v54  ;;  %v536_v10 = vsel %vm2368_vm12, %v2401_v45, 0.0  ;;  %v1981_v54 = vpack.i.bf16 %v495_v37, %v494_v59 }
  0x28   : > { %1937 = vrot.lane.b32.xlu1 %v1936_v18, %s2083_s11  ;;  %900 = vmatprep.subr.mxu0 %v2078_v2  ;;  %v537_v18 = vsel %vm2357_vm10, %v2425_v63, 0.0 }
  0x29   : > { %901 = vmatpush1.msra.mxu0 %v824_v56  ;;  %v1976_v25 = vpack.i.bf16 %v537_v18, %v536_v10  ;;  %v2503_v56 = vld [vmem:[%s2167_s18 + $0x42] sm:$0xff]  ;;  %v538_v10 = vsel %vm2427_vm13, %v512_v44, 0.0 }
  0x2a   : > { %902 = vmatprep.subr.mxu0 %v2078_v2  ;;  %v548_v57 = vsel %vm2479_vm15, %v2503_v56, 0.0  ;;  %v531_v18 = vld [vmem:[%s2167_s18 + $0x48] sm:$0xff] }
  0x2b   : > { %1942 = vrot.lane.b32.xlu0 %v1941_v41, %s2084_s12  ;;  %903 = vmatpush1.msra.mxu0 %v823_v5  ;;  %v547_v41 = vsel %vm2361_vm11, %v2470_v26, 0.0  ;;  %v521_v5 = vld [vmem:[%s2167_s18 + $0x41] sm:$0xff]  ;;  %vm3107_vm11 = vcmask 392192  }
  0x2c   : > { %1947 = vrot.lane.b32.xlu1 %v1946_v42, %s2085_s17  ;;  %932 = vmatprep.subr.mxu0 %v2078_v2  ;;  %vm3108_vm1 = vmmov %vm3107_vm11 }
  0x2d   : > { %933 = vmatpush2.msra.mxu0 %v840_v21  ;;  %v530_v21 = vsel %vm2483_vm0, %v2503_v56, 0.0  ;;  %vm3105_vm0 = vcmask 130048  }
  0x2e   : > { %934 = vmatprep.subr.mxu0 %v2078_v2  ;;  %v520_v2 = vsel %vm2431_vm14, %v512_v44, 0.0  ;;  %vm3111_vm2 = vmmov %vm3105_vm0 }
  0x2f   : > { %1952 = vrot.lane.b32.xlu0 %v1946_v42, %s2079_s21  ;;  %935 = vmatpush2.msra.mxu0 %v839_v28  ;;  %vm3114_vm4 = vmmov %vm3105_vm0 }
  0x30   : > { %1957 = vrot.lane.b32.xlu1 %v1956_v55, %s2081_s29  ;;  %v519_v55 = vsel %vm2427_vm13, %v2425_v63, 0.0  ;;  %vm796_vm13 = vcmask 654336   ;;  %vm3116_vm5 = vmmov %vm3105_vm0 }
  0x31   : > { %v1996_v59 = vpack.i.bf16 %v520_v2, %v519_v55  ;;  %vm3117_vm12 = vmmov %vm3105_vm0 }
  0x33   : > { %1962 = vrot.lane.b32.xlu0 %v1961_v8, %s2082_s30  ;;  %v2001_v8 = vpack.i.bf16 %v521_v5, %v495_v37 }
  0x34   : > { %1967 = vrot.lane.b32.xlu1 %v1966_v14, %s2080_s22  ;;  %v529_v14 = vsel %vm2479_vm15, %v2470_v26, 0.0  ;;  %vm787_vm15 = vcmask 523264  }
  0x37   : > { %1972 = vrot.lane.b32.xlu0 %v1971_v22, %s2083_s11  ;;  %v539_v22 = vsel %vm2431_vm14, %v531_v18, 0.0  ;;  %vm3106_vm14 = vmmov %vm3105_vm0 }
  0x38   : > { %1977 = vrot.lane.b32.xlu1 %v1976_v25, %s2084_s12  ;;  %v540_v25 = vld [vmem:[%s2167_s18 + $0x49] sm:$0xff] }
  0x3b   : > { %1982 = vrot.lane.b32.xlu0 %v1981_v54, %s2085_s17 }
  0x3c   : > { %1987 = vrot.lane.b32.xlu1 %v1981_v54, %s2079_s21 }
  0x3f   : > { %1992 = vrot.lane.b32.xlu0 %v1991_v58, %s2081_s29 }
  0x40   : > { %1997 = vrot.lane.b32.xlu1 %v1996_v59, %s2082_s30 }
  0x43   : > { %2002 = vrot.lane.b32.xlu0 %v2001_v8, %s2080_s22 }
  0x44   : > { %691 = vrot.lane.b32.xlu1 %v529_v14, %s2083_s11 }
  0x47   : > { %723 = vrot.lane.b32.xlu0 %v538_v10, %s2084_s12 }
  0x48   : > { %748 = vrot.lane.b32.xlu1 %v521_v5, %s2085_s17 }
  0x4b   : > { %693 = vrot.lane.b32.xlu0 %v530_v21, %s2083_s11 }
  0x4c   : > { %725 = vrot.lane.b32.xlu1 %v539_v22, %s2084_s12 }
  0x4f   : > { %750 = vrot.lane.b32.xlu0 %v540_v25, %s2085_s17 }
  0x84   : > { %v1883_v28 = vpop.permute.xlu0 %1882 }
  0x85   : > { %v1888_v37 = vpop.permute.xlu1 %1887  ;;  %v1885_v44 = vunpack.i.h.bf16 %v1883_v28  ;;  %v1884_v54 = vunpack.i.l.bf16 %v1883_v28 }
  0x86   : > { %v1889_v18 = vunpack.i.l.bf16 %v1888_v37  ;;  %v1890_v25 = vunpack.i.h.bf16 %v1888_v37 }
  0x87   : > { %v761_v5 = vsel %vm3105_vm0, %v480_v9, %v1884_v54  ;;  %v762_v8 = vsel %vm3106_vm14, %v481_v29, %v1885_v44  ;;  %vm814_vm14 = vcmask 916480  }
  0x89   : > { %v1893_v46 = vpop.permute.xlu0 %1892 }
  0x8a   : > { %v1898_v53 = vpop.permute.xlu1 %1897  ;;  %v1895_v55 = vunpack.i.h.bf16 %v1893_v46  ;;  %v1894_v2 = vunpack.i.l.bf16 %v1893_v46 }
  0x8b   : > { %v1900_v58 = vunpack.i.h.bf16 %v1898_v53  ;;  %v1899_v59 = vunpack.i.l.bf16 %v1898_v53 }
  0x8c   : > { %v770_v14 = vsel %vm769_vm8, %v761_v5, %v1894_v2  ;;  %v771_v10 = vsel %vm769_vm8, %v762_v8, %v1895_v55 }
  0x8d   : > { %v779_v21 = vsel %vm3107_vm11, %v770_v14, %v1899_v59  ;;  %v1903_v22 = vpop.permute.xlu0 %1902  ;;  %v780_v62 = vsel %vm3108_vm1, %v771_v10, %v1900_v58  ;;  %vm3109_vm11 = vmmov %vm3105_vm0 }
  0x8e   : > { %v1913_v11 = vpop.permute.xlu1 %1912  ;;  %v1904_v9 = vunpack.i.l.bf16 %v1903_v22  ;;  %v788_v24 = vsel %vm787_vm15, %v779_v21, %v1889_v18  ;;  %v1905_v28 = vunpack.i.h.bf16 %v1903_v22  ;;  %v789_v46 = vsel %vm787_vm15, %v780_v62, %v1890_v25  ;;  %vm3110_vm1 = vmmov %vm3105_vm0 }
  0x8f   : > { %v1914_v23 = vunpack.i.l.bf16 %v1913_v11  ;;  %v1915_v2 = vunpack.i.h.bf16 %v1913_v11  ;;  %vm3133_vm10 = vmmov %vm3110_vm1 }
  0x90   : > { %v797_v29 = vsel %vm796_vm13, %v788_v24, %v1904_v9  ;;  %v798_v8 = vsel %vm796_vm13, %v789_v46, %v1905_v28 }
  0x91   : > { %v1908_v44 = vpop.permute.xlu0 %1907  ;;  %v806_v58 = vsel %vm805_vm3, %v797_v29, %v1914_v23 }
  0x92   : > { %v1918_v54 = vpop.permute.xlu1 %1917  ;;  %v1909_v53 = vunpack.i.l.bf16 %v1908_v44  ;;  %v1910_v5 = vunpack.i.h.bf16 %v1908_v44 }
  0x93   : > { %v1919_v55 = vunpack.i.l.bf16 %v1918_v54  ;;  %v1920_v59 = vunpack.i.h.bf16 %v1918_v54 }
  0x94   : > { %v815_v37 = vsel %vm814_vm14, %v806_v58, %v1909_v53 }
  0x95   : > { %v763_v14 = vsel %vm3109_vm11, %v482_v12, %v1919_v55  ;;  %v1923_v10 = vpop.permute.xlu0 %1922  ;;  %937 = vmatmul.mubr.f32.vlgmr.msra.gmra.mxu0 %v815_v37  ;;  %v764_v50 = vsel %vm3110_vm1, %v483_v13, %v1920_v59  ;;  %v807_v12 = vsel %vm805_vm3, %v798_v8, %v1915_v2  ;;  %vm3115_vm11 = vmmov %vm3105_vm0 }
  0x96   : > { %v1928_v18 = vpop.permute.xlu1 %1927  ;;  %v1925_v21 = vunpack.i.h.bf16 %v1923_v10  ;;  %v1924_v22 = vunpack.i.l.bf16 %v1923_v10  ;;  %1780 = vmatprep.mubr.msk.f32.mxu0 %vm3105_vm0, %v543_v35  ;;  %v816_v62 = vsel %vm814_vm14, %v807_v12, %v1910_v5  ;;  %vm3118_vm0 = vmmov %vm3112_vm6 }
  0x97   : > { %v1929_v27 = vunpack.i.l.bf16 %v1928_v18  ;;  %v1930_v9 = vunpack.i.h.bf16 %v1928_v18  ;;  %vm3119_vm9 = vmmov %vm3118_vm0 }
  0x98   : > { %v772_v11 = vsel %vm769_vm8, %v763_v14, %v1924_v22  ;;  %v773_v49 = vsel %vm769_vm8, %v764_v50, %v1925_v21 }
  0x99   : > { %v1933_v25 = vpop.permute.xlu0 %1932  ;;  %942 = vmatmul.mubr.f32.gmra.mxu0 %v816_v62  ;;  %v781_v34 = vsel %vm3112_vm6, %v772_v11, %v1929_v27  ;;  %v782_v24 = vsel %vm3113_vm7, %v773_v49, %v1930_v9  ;;  %vm3122_vm6 = vmmov %vm3110_vm1 }
  0x9a   : > { %v1938_v20 = vpop.permute.xlu1 %1937  ;;  %v1935_v35 = vunpack.i.h.bf16 %v1933_v25  ;;  %v1934_v23 = vunpack.i.l.bf16 %v1933_v25  ;;  %1781 = vmatprep.mubr.msk.f32.mxu0 %vm3111_vm2, %v544_v39  ;;  %vm3134_vm2 = vmmov %vm3110_vm1 }
  0x9b   : > { %v1939_v51 = vunpack.i.l.bf16 %v1938_v20  ;;  %v1940_v28 = vunpack.i.h.bf16 %v1938_v20  ;;  %vm3136_vm7 = vmmov %vm3110_vm1 }
  0x9c   : > { %v790_v13 = vsel %vm787_vm15, %v781_v34, %v1934_v23  ;;  %v791_v54 = vsel %vm787_vm15, %v782_v24, %v1935_v35 }
  0x9d   : > { %v1943_v29 = vpop.permute.xlu0 %1942  ;;  %v799_v47 = vsel %vm796_vm13, %v790_v13, %v1939_v51  ;;  %v800_v5 = vsel %vm796_vm13, %v791_v54, %v1940_v28 }
  0x9e   : > { %v1948_v44 = vpop.permute.xlu1 %1947  ;;  %v1945_v46 = vunpack.i.h.bf16 %v1943_v29  ;;  %v1944_v53 = vunpack.i.l.bf16 %v1943_v29 }
  0x9f   : > { %v1949_v55 = vunpack.i.l.bf16 %v1948_v44  ;;  %v1950_v39 = vunpack.i.h.bf16 %v1948_v44 }
  0xa0   : > { %v808_v60 = vsel %vm805_vm3, %v799_v47, %v1944_v53  ;;  %v809_v8 = vsel %vm805_vm3, %v800_v5, %v1945_v46 }
  0xa1   : > { %v1953_v2 = vpop.permute.xlu0 %1952  ;;  %v817_v58 = vsel %vm814_vm14, %v808_v60, %v1949_v55  ;;  %v818_v50 = vsel %vm814_vm14, %v809_v8, %v1950_v39 }
  0xa2   : > { %v1958_v59 = vpop.permute.xlu1 %1957  ;;  %v1954_v37 = vunpack.i.l.bf16 %v1953_v2  ;;  %947 = vmatmul.mubr.f32.gmra.mxu0 %v817_v58  ;;  %v1955_v10 = vunpack.i.h.bf16 %v1953_v2 }
  0xa3   : > { %v1959_v14 = vunpack.i.l.bf16 %v1958_v59  ;;  %1782 = vmatprep.mubr.msk.f32.mxu0 %vm3114_vm4, %v545_v40  ;;  %v1960_v12 = vunpack.i.h.bf16 %v1958_v59  ;;  %vm3124_vm4 = vmmov %vm3110_vm1 }
  0xa4   : > { %v765_v18 = vsel %vm3115_vm11, %v484_v38, %v1954_v37  ;;  %v766_v52 = vsel %vm3117_vm12, %v485_v36, %v1955_v10  ;;  %vm3127_vm12 = vmmov %vm3118_vm0 }
  0xa5   : > { %v1963_v21 = vpop.permute.xlu0 %1962  ;;  %v774_v48 = vsel %vm769_vm8, %v765_v18, %v1959_v14  ;;  %v775_v9 = vsel %vm769_vm8, %v766_v52, %v1960_v12  ;;  %vm3139_vm11 = vmmov %vm3110_vm1 }
  0xa6   : > { %v1968_v22 = vpop.permute.xlu1 %1967  ;;  %v1964_v27 = vunpack.i.l.bf16 %v1963_v21  ;;  %952 = vmatmul.mubr.f32.gmra.mxu0 %v818_v50  ;;  %v1965_v32 = vunpack.i.h.bf16 %v1963_v21  ;;  %v1778_v50 = vld [vmem:[%s3060_s2] ss:$0 sm:$0xff] }
  0xa7   : > { %v1969_v11 = vunpack.i.l.bf16 %v1968_v22  ;;  %1783 = vmatprep.mubr.msk.f32.mxu0 %vm3116_vm5, %v546_v19  ;;  %v1970_v25 = vunpack.i.h.bf16 %v1968_v22  ;;  %vm3126_vm5 = vmmov %vm3110_vm1 }
  0xa8   : > { %v783_v33 = vsel %vm3118_vm0, %v774_v48, %v1964_v27  ;;  %v784_v19 = vsel %vm3119_vm9, %v775_v9, %v1965_v32 }
  0xa9   : > { %v1973_v38 = vpop.permute.xlu0 %1972  ;;  %v792_v30 = vsel %vm787_vm15, %v783_v33, %v1969_v11  ;;  %v793_v23 = vsel %vm787_vm15, %v784_v19, %v1970_v25 }
  0xaa   : > { %v1978_v40 = vpop.permute.xlu1 %1977  ;;  %v1974_v62 = vunpack.i.l.bf16 %v1973_v38  ;;  %v1975_v20 = vunpack.i.h.bf16 %v1973_v38 }
  0xab   : > { %v1979_v61 = vunpack.i.l.bf16 %v1978_v40  ;;  %v1980_v34 = vunpack.i.h.bf16 %v1978_v40 }
  0xac   : > { %v801_v4 = vsel %vm796_vm13, %v792_v30, %v1974_v62  ;;  %v802_v28 = vsel %vm796_vm13, %v793_v23, %v1975_v20 }
  0xad   : > { %v1983_v15 = vpop.permute.xlu0 %1982  ;;  %v810_v51 = vsel %vm805_vm3, %v801_v4, %v1979_v61  ;;  %v811_v47 = vsel %vm805_vm3, %v802_v28, %v1980_v34  ;;  %v1028_v4 = vld [vmem:[%s3061_s3 + $0x10] sm:$0xff]  ;;  %v1026_v34 = vld [vmem:[%s3061_s3] sm:$0xff] }
  0xae   : > { %v1988_v49 = vpop.permute.xlu1 %1987  ;;  %v1984_v36 = vunpack.i.l.bf16 %v1983_v15  ;;  %v1985_v13 = vunpack.i.h.bf16 %v1983_v15  ;;  %1828 = vmatprep.subr.mxu1 %v1028_v4 }
  0xaf   : > { %v1989_v35 = vunpack.i.l.bf16 %v1988_v49  ;;  %v1990_v46 = vunpack.i.h.bf16 %v1988_v49  ;;  %1829 = vmatpush3.msra.mxu1 %v1028_v4 }
  0xb0   : > { %v819_v24 = vsel %vm814_vm14, %v810_v51, %v1984_v36  ;;  %v820_v45 = vsel %vm814_vm14, %v811_v47, %v1985_v13  ;;  %v1027_v36 = vld [vmem:[%s3061_s3 + $0x8] sm:$0xff] }
  0xb1   : > { %v767_v29 = vsel %vm3110_vm1, %v486_v6, %v1989_v35  ;;  %v1993_v44 = vpop.permute.xlu0 %1992  ;;  %957 = vmatmul.mubr.f32.gmra.mxu0 %v819_v24  ;;  %v768_v31 = vsel %vm3124_vm4, %v487_v7, %v1990_v46  ;;  %1830 = vmatprep.subr.mxu1 %v1027_v36  ;;  %v2728_v47 = vld [vmem:[%s3063_s5 + $0x8] sm:$0xff] }
  0xb2   : > { %v1998_v54 = vpop.permute.xlu1 %1997  ;;  %v1994_v53 = vunpack.i.l.bf16 %v1993_v44  ;;  %1784 = vmatprep.mubr.msk.f32.mxu0 %vm3122_vm6, %v547_v41  ;;  %v1995_v60 = vunpack.i.h.bf16 %v1993_v44  ;;  %1831 = vmatpush3.msra.mxu1 %v1027_v36  ;;  %vm3135_vm6 = vmmov %vm3110_vm1 }
  0xb3   : > { %v1999_v55 = vunpack.i.l.bf16 %v1998_v54  ;;  %v2000_v2 = vunpack.i.h.bf16 %v1998_v54  ;;  %1832 = vmatprep.subr.mxu1 %v1026_v34 }
  0xb4   : > { %v776_v1 = vsel %vm769_vm8, %v767_v29, %v1994_v53  ;;  %v777_v58 = vsel %vm769_vm8, %v768_v31, %v1995_v60  ;;  %vm3129_vm8 = vmmov %vm3110_vm1  ;;  %1833 = vmatpush3.msra.mxu1 %v1026_v34  ;;  %v2749_v60 = vld [vmem:[%s3063_s5 + $0x10] sm:$0xff]  ;;  %v2770_v31 = vld [vmem:[%s3063_s5 + $0x38] sm:$0xff] }
  0xb5   : > { %v2003_v6 = vpop.permute.xlu0 %2002  ;;  %962 = vmatmul.mubr.f32.gmra.mxu0 %v820_v45  ;;  %v785_v41 = vsel %vm3127_vm12, %v776_v1, %v1999_v55  ;;  %v786_v56 = vsel %vm3118_vm0, %v777_v58, %v2000_v2  ;;  %v2708_v55 = vld [vmem:[%s3062_s4 + $0x8] sm:$0xff]  ;;  %v2735_v1 = vld [vmem:[%s3063_s5] sm:$0xff]  ;;  %v2742_v45 = vld [vmem:[%s3063_s5 + $0x18] sm:$0xff] }
  0xb6   : > { %v692_v39 = vpop.permute.xlu1 %691  ;;  %v2004_v26 = vunpack.i.l.bf16 %v2003_v6  ;;  %1785 = vmatprep.mubr.msk.f32.mxu0 %vm3126_vm5, %v548_v57  ;;  %v2005_v5 = vunpack.i.h.bf16 %v2003_v6  ;;  %1846 = vmatprep.subr.mxu1 %v2708_v55  ;;  %v2756_v6 = vld [vmem:[%s3063_s5 + $0x28] sm:$0xff]  ;;  %v2791_v2 = vld [vmem:[%s3064_s6] sm:$0xff]  ;;  %v2805_v58 = vld [vmem:[%s3064_s6 + $0x10] sm:$0xff] }
  0xb7   : > { %vm3140_vm5 = vmmov %vm3110_vm1 }
  0xb8   : > { %v794_v59 = vsel %vm787_vm15, %v785_v41, %v2004_v26  ;;  %v795_v8 = vsel %vm787_vm15, %v786_v56, %v2005_v5  ;;  %vm977_vm15 = vcmask 195584   ;;  %v2777_v26 = vld [vmem:[%s3063_s5 + $0x30] sm:$0xff]  ;;  %v2784_v41 = vld [vmem:[%s3064_s6 + $0x8] sm:$0xff]  ;;  %vm3141_vm12 = vmmov %vm3110_vm1 }
  0xb9   : > { %v803_v3 = vsel %vm796_vm13, %v794_v59, %v692_v39  ;;  %v724_v63 = vpop.permute.xlu0 %723  ;;  %v2763_v39 = vld [vmem:[%s3063_s5 + $0x20] sm:$0xff]  ;;  %v2798_v59 = vld [vmem:[%s3064_s6 + $0x18] sm:$0xff]  ;;  %v2812_v5 = vld [vmem:[%s3064_s6 + $0x28] sm:$0xff] }
  0xba   : > { %v749_v37 = vpop.permute.xlu1 %748  ;;  %v812_v7 = vsel %vm805_vm3, %v803_v3, %v724_v63  ;;  %v2819_v3 = vld [vmem:[%s3064_s6 + $0x20] sm:$0xff]  ;;  %v2826_v63 = vld [vmem:[%s3064_s6 + $0x38] sm:$0xff]  ;;  %vm3142_vm0 = vmmov %vm3110_vm1 }
  0xbb   : > { %v821_v42 = vsel %vm814_vm14, %v812_v7, %v749_v37  ;;  %v2833_v37 = vld [vmem:[%s3064_s6 + $0x30] sm:$0xff]  ;;  %vm3143_vm9 = vmmov %vm3142_vm0 }
  0xbc   : > { %967 = vmatmul.mubr.f32.gmra.mxu0 %v821_v42 }
  0xbd   : > { %v694_v57 = vpop.permute.xlu0 %693  ;;  %1786 = vmatprep.mubr.msk.f32.mxu0 %vm3129_vm8, %v549_v17  ;;  %vm3144_vm8 = vmmov %vm3142_vm0 }
  0xbe   : > { %v804_v14 = vsel %vm796_vm13, %v795_v8, %v694_v57  ;;  %v726_v10 = vpop.permute.xlu1 %725  ;;  %vm3130_vm13 = vmmov %vm3110_vm1 }
  0xbf   : > { %v813_v18 = vsel %vm805_vm3, %v804_v14, %v726_v10  ;;  %vm3131_vm3 = vmmov %vm3110_vm1 }
  0xc1   : > { %v751_v21 = vpop.permute.xlu0 %750 }
  0xc2   : > { %v822_v22 = vsel %vm814_vm14, %v813_v18, %v751_v21  ;;  %vm3132_vm14 = vmmov %vm3110_vm1 }
  0xc3   : > { %972 = vmatmul.mubr.f32.gmra.mxu0 %v822_v22 }
 0x155   : > { %v938_v27 = vpop.f32.mrf.mxu0 }
 0x156   : > { %v2664_v43 = vadd.f32 %v1778_v50, %v938_v27 }
 0x157   : > { %v940_v16 = vpop.f32.mrf.mxu0 }
 0x158   : > { %v978_v17 = vsel %vm977_vm15, %v2664_v43, -inf }
 0x159   : > { %v943_v12 = vpop.f32.mrf.mxu0  ;;  %979 = vmax.xlane.f32.xlu1 %v978_v17 }
 0x15a   : > { %v2668_v48 = vadd.f32 %v1778_v50, %v943_v12  ;;  %v1182_v12 = vld [vmem:[%s3062_s4] sm:$0xff] }
 0x15b   : > { %v945_v11 = vpop.f32.mrf.mxu0 }
 0x15c   : > { %v981_v52 = vsel %vm977_vm15, %v2668_v48, -inf }
 0x15d   : > { %982 = vmax.xlane.f32.xlu0 %v981_v52 }
 0x162   : > { %v948_v32 = vpop.f32.mrf.mxu0 }
 0x163   : > { %v2672_v33 = vadd.f32 %v1778_v50, %v948_v32 }
 0x164   : > { %v950_v38 = vpop.f32.mrf.mxu0 }
 0x165   : > { %v984_v40 = vsel %vm977_vm15, %v2672_v33, -inf }
 0x166   : > { %v953_v62 = vpop.f32.mrf.mxu0  ;;  %985 = vmax.xlane.f32.xlu0 %v984_v40 }
 0x167   : > { %v2676_v9 = vadd.f32 %v1778_v50, %v953_v62 }
 0x168   : > { %v955_v25 = vpop.f32.mrf.mxu0 }
 0x169   : > { %v987_v30 = vsel %vm977_vm15, %v2676_v9, -inf }
 0x16a   : > { %988 = vmax.xlane.f32.xlu1 %v987_v30 }
 0x171   : > { %v958_v61 = vpop.f32.mrf.mxu0 }
 0x172   : > { %v2680_v19 = vadd.f32 %v1778_v50, %v958_v61 }
 0x173   : > { %v960_v20 = vpop.f32.mrf.mxu0 }
 0x174   : > { %v990_v15 = vsel %vm977_vm15, %v2680_v19, -inf }
 0x175   : > { %v963_v49 = vpop.f32.mrf.mxu0  ;;  %991 = vmax.xlane.f32.xlu0 %v990_v15 }
 0x176   : > { %v2690_v35 = vadd.f32 %v1778_v50, %v963_v49 }
 0x177   : > { %v965_v23 = vpop.f32.mrf.mxu0 }
 0x178   : > { %v993_v51 = vsel %vm977_vm15, %v2690_v35, -inf }
 0x179   : > { %994 = vmax.xlane.f32.xlu1 %v993_v51 }
 0x17c   : > { %v968_v13 = vpop.f32.mrf.mxu0 }
 0x17d   : > { %v2697_v24 = vadd.f32 %v1778_v50, %v968_v13 }
 0x17e   : > { %v970_v28 = vpop.f32.mrf.mxu0 }
 0x17f   : > { %v996_v29 = vsel %vm977_vm15, %v2697_v24, -inf }
 0x180   : > { %997 = vmax.xlane.f32.xlu0 %v996_v29 }
 0x183   : > { %v973_v44 = vpop.f32.mrf.mxu0 }
 0x184   : > { %v2701_v54 = vadd.f32 %v1778_v50, %v973_v44 }
 0x185   : > { %v975_v46 = vpop.f32.mrf.mxu0 }
 0x186   : > { %v999_v53 = vsel %vm977_vm15, %v2701_v54, -inf }
 0x187   : > { %1000 = vmax.xlane.f32.xlu1 %v999_v53 }
 0x196   : > { %1192 = vrot.lane.b32.xlu0 %v2664_v43, %s2086_s9 }
 0x198   : > { %1194 = vrot.lane.b32.xlu1 %v2668_v48, %s2086_s9 }
 0x19a   : > { %1198 = vrot.lane.b32.xlu0 %v2676_v9, %s2086_s9 }
 0x19c   : > { %1196 = vrot.lane.b32.xlu1 %v2672_v33, %s2086_s9 }
 0x19e   : > { %1202 = vrot.lane.b32.xlu0 %v2690_v35, %s2086_s9 }
 0x1a0   : > { %1200 = vrot.lane.b32.xlu1 %v2680_v19, %s2086_s9 }
 0x1a2   : > { %1206 = vrot.lane.b32.xlu0 %v2701_v54, %s2086_s9 }
 0x1a4   : > { %1204 = vrot.lane.b32.xlu1 %v2697_v24, %s2086_s9 }
 0x1a6   : > { %1363 = vrot.lane.b32.xlu0 %v2728_v47, %s2087_s16 }
 0x1a8   : > { %1361 = vrot.lane.b32.xlu1 %v2735_v1, %s2087_s16 }
 0x1aa   : > { %1367 = vrot.lane.b32.xlu0 %v2742_v45, %s2087_s16 }
 0x1ac   : > { %1365 = vrot.lane.b32.xlu1 %v2749_v60, %s2087_s16 }
 0x1ae   : > { %1371 = vrot.lane.b32.xlu0 %v2756_v6, %s2087_s16 }
 0x1b0   : > { %1369 = vrot.lane.b32.xlu1 %v2763_v39, %s2087_s16 }
 0x1b2   : > { %1375 = vrot.lane.b32.xlu0 %v2770_v31, %s2087_s16 }
 0x1b4   : > { %1373 = vrot.lane.b32.xlu1 %v2777_v26, %s2087_s16 }
 0x1b6   : > { %1403 = vrot.lane.b32.xlu0 %v2784_v41, %s2087_s16 }
 0x1b8   : > { %1401 = vrot.lane.b32.xlu1 %v2791_v2, %s2087_s16 }
 0x1ba   : > { %1407 = vrot.lane.b32.xlu0 %v2798_v59, %s2087_s16 }
 0x1bc   : > { %1405 = vrot.lane.b32.xlu1 %v2805_v58, %s2087_s16 }
 0x1be   : > { %1411 = vrot.lane.b32.xlu0 %v2812_v5, %s2087_s16 }
 0x1c0   : > { %1409 = vrot.lane.b32.xlu1 %v2819_v3, %s2087_s16 }
 0x1c2   : > { %1415 = vrot.lane.b32.xlu0 %v2826_v63, %s2087_s16 }
 0x1c4   : > { %1413 = vrot.lane.b32.xlu1 %v2833_v37, %s2087_s16 }
 0x1e2   : > { %v980_v7 = vpop.xlane.xlu1 %979 }
 0x1e3   : > { %v1002_v42 = vsub.f32 %v2664_v43, %v980_v7 }
 0x1e5   : > { %v1010_v56 = vmul.f32 1.442695, %v1002_v42 }
 0x1e6   : > { %v983_v57 = vpop.xlane.xlu0 %982 }
 0x1e7   : > { %2006 = vpow2.f32 %v1010_v56  ;;  %v1003_v8 = vsub.f32 %v2668_v48, %v983_v57 }
 0x1e9   : > { %v1012_v14 = vmul.f32 1.442695, %v1003_v8 }
 0x1eb   : > { %2008 = vpow2.f32 %v1012_v14 }
 0x1ef   : > { %v986_v10 = vpop.xlane.xlu0 %985 }
 0x1f0   : > { %v1004_v18 = vsub.f32 %v2672_v33, %v986_v10 }
 0x1f2   : > { %v1014_v21 = vmul.f32 1.442695, %v1004_v18 }
 0x1f3   : > { %v989_v22 = vpop.xlane.xlu1 %988 }
 0x1f4   : > { %v2842_v50 = vpop.eup %2006  ;;  %2010 = vpow2.f32 %v1014_v21  ;;  %v1005_v27 = vsub.f32 %v2676_v9, %v989_v22 }
 0x1f5   : > { %1834 = vmatprep.mubr.msk.f32.mxu1 %vm977_vm15, %v2842_v50 }
 0x1f6   : > { %v1016_v16 = vmul.f32 1.442695, %v1005_v27 }
 0x1f8   : > { %v2009_v17 = vpop.eup %2008  ;;  %2012 = vpow2.f32 %v1016_v16 }
 0x1f9   : > { %1835 = vmatmul.mubr.msk.f32.vlgmr.msra.gmra.mxu1 %vm977_vm15, %v2009_v17 }
 0x1fa   : > { %1847 = vmatpush3.msra.mxu1 %v2708_v55 }
 0x1fb   : > { %1848 = vmatprep.subr.mxu1 %v1182_v12 }
 0x1fc   : > { %1849 = vmatpush3.msra.mxu1 %v1182_v12 }
 0x1fe   : > { %v992_v11 = vpop.xlane.xlu0 %991 }
 0x1ff   : > { %v1006_v52 = vsub.f32 %v2680_v19, %v992_v11 }
 0x201   : > { %v2853_v32 = vpop.eup %2010  ;;  %v1018_v38 = vmul.f32 1.442695, %v1006_v52 }
 0x202   : > { %1837 = vmatprep.mubr.msk.f32.mxu1 %vm977_vm15, %v2853_v32  ;;  %v995_v40 = vpop.xlane.xlu1 %994 }
 0x203   : > { %2014 = vpow2.f32 %v1018_v38  ;;  %v1007_v62 = vsub.f32 %v2690_v35, %v995_v40 }
 0x205   : > { %v2013_v25 = vpop.eup %2012  ;;  %v1020_v30 = vmul.f32 1.442695, %v1007_v62 }
 0x206   : > { %1838 = vmatmul.mubr.msk.f32.gmra.mxu1 %vm977_vm15, %v2013_v25 }
 0x207   : > { %2016 = vpow2.f32 %v1020_v30 }
 0x209   : > { %v998_v61 = vpop.xlane.xlu0 %997 }
 0x20a   : > { %v1008_v20 = vsub.f32 %v2697_v24, %v998_v61 }
 0x20c   : > { %v1022_v4 = vmul.f32 1.442695, %v1008_v20 }
 0x20d   : > { %v1193_v28 = vpop.permute.xlu0 %1192 }
 0x20e   : > { %2018 = vpow2.f32 %v1022_v4 }
 0x210   : > { %v2015_v15 = vpop.eup %2014  ;;  %v1001_v49 = vpop.xlane.xlu1 %1000 }
 0x211   : > { %v1009_v36 = vsub.f32 %v2701_v54, %v1001_v49  ;;  %1840 = vmatprep.mubr.msk.f32.mxu1 %vm977_vm15, %v2015_v15  ;;  %v1199_v46 = vpop.permute.xlu0 %1198 }
 0x213   : > { %v1024_v23 = vmul.f32 1.442695, %v1009_v36 }
 0x214   : > { %v2017_v34 = vpop.eup %2016  ;;  %v1195_v13 = vpop.permute.xlu1 %1194 }
 0x215   : > { %2020 = vpow2.f32 %v1024_v23  ;;  %1841 = vmatmul.mubr.msk.f32.gmra.mxu1 %vm977_vm15, %v2017_v34  ;;  %v1203_v55 = vpop.permute.xlu0 %1202 }
 0x218   : > { %v1197_v44 = vpop.permute.xlu1 %1196 }
 0x219   : > { %v1207_v42 = vpop.permute.xlu0 %1206 }
 0x21b   : > { %v2863_v51 = vpop.eup %2018 }
 0x21c   : > { %1843 = vmatprep.mubr.msk.f32.mxu1 %vm977_vm15, %v2863_v51  ;;  %v1201_v53 = vpop.permute.xlu1 %1200 }
 0x220   : > { %v1205_v7 = vpop.permute.xlu1 %1204 }
 0x222   : > { %v2867_v29 = vpop.eup %2020 }
 0x223   : > { %1844 = vmatmul.mubr.msk.f32.gmra.mxu1 %vm977_vm15, %v2867_v29 }
 0x224   : > { %1850 = vmatprep.mubr.msk.f32.mxu1 %vm3130_vm13, %v1193_v28  ;;  %vm3146_vm13 = vmmov %vm3142_vm0 }
 0x227   : > { %1851 = vmatmul.mubr.msk.f32.vlgmr.msra.gmra.mxu1 %vm3131_vm3, %v1195_v13 }
 0x228   : > { %1853 = vmatprep.mubr.msk.f32.mxu1 %vm3132_vm14, %v1197_v44 }
 0x22b   : > { %1854 = vmatmul.mubr.msk.f32.gmra.mxu1 %vm3133_vm10, %v1199_v46 }
 0x22c   : > { %1856 = vmatprep.mubr.msk.f32.mxu1 %vm3110_vm1, %v1201_v53 }
 0x22f   : > { %1857 = vmatmul.mubr.msk.f32.gmra.mxu1 %vm3134_vm2, %v1203_v55 }
 0x230   : > { %1859 = vmatprep.mubr.msk.f32.mxu1 %vm3135_vm6, %v1205_v7  ;;  %v1538_v7 = vmul.f32 0.2, %v2668_v48 }
 0x233   : > { %1860 = vmatmul.mubr.msk.f32.gmra.mxu1 %vm3136_vm7, %v1207_v42 }
 0x2b9   : > { %v1836_v56 = vpop.f32.mrf.mxu1 }
 0x2ba   : > { %2022 = vrcp.f32 %v1836_v56 }
 0x2bb   : > { %v1119_v57 = vpop.f32.mrf.mxu1 }
 0x2bc   : > { %2024 = vrcp.f32 %v1119_v57 }
 0x2c6   : > { %v1839_v8 = vpop.f32.mrf.mxu1 }
 0x2c7   : > { %v2023_v14 = vpop.eup %2022  ;;  %2026 = vrcp.f32 %v1839_v8 }
 0x2c8   : > { %v1167_v10 = vmul.f32 %v2023_v14, %v2009_v17  ;;  %v1129_v18 = vpop.f32.mrf.mxu1 }
 0x2c9   : > { %v2025_v21 = vpop.eup %2024  ;;  %2028 = vrcp.f32 %v1129_v18 }
 0x2ca   : > { %1175 = vst.msk [vmem:[%s2885_s13 + $0x8] sm:$0xff] %vm977_vm15, %v1167_v10  ;;  %v1166_v22 = vmul.f32 %v2025_v21, %v2842_v50  ;;  %v1537_v10 = vmul.f32 0.2, %v2664_v43 }
 0x2cc   : > { %1174 = vst.msk [vmem:[%s2885_s13] sm:$0xff] %vm977_vm15, %v1166_v22 }
 0x2d4   : > { %v2027_v27 = vpop.eup %2026 }
 0x2d5   : > { %v1169_v16 = vmul.f32 %v2027_v27, %v2013_v25  ;;  %v1842_v12 = vpop.f32.mrf.mxu1 }
 0x2d6   : > { %v2029_v11 = vpop.eup %2028  ;;  %2030 = vrcp.f32 %v1842_v12 }
 0x2d7   : > { %1177 = vst.msk [vmem:[%s2885_s13 + $0x18] sm:$0xff] %vm977_vm15, %v1169_v16  ;;  %v1168_v17 = vmul.f32 %v2029_v11, %v2853_v32  ;;  %v1139_v52 = vpop.f32.mrf.mxu1  ;;  %v1547_v16 = vmul.f32 1.442695, %v1538_v7 }
 0x2d8   : > { %2032 = vrcp.f32 %v1139_v52  ;;  %v1539_v52 = vmul.f32 0.2, %v2672_v33 }
 0x2d9   : > { %1176 = vst.msk [vmem:[%s2885_s13 + $0x10] sm:$0xff] %vm977_vm15, %v1168_v17 }
 0x2e3   : > { %v2031_v38 = vpop.eup %2030  ;;  %v1845_v40 = vpop.f32.mrf.mxu1 }
 0x2e4   : > { %v1171_v50 = vmul.f32 %v2031_v38, %v2017_v34  ;;  %2034 = vrcp.f32 %v1845_v40  ;;  %v1545_v38 = vmul.f32 1.442695, %v1537_v10 }
 0x2e5   : > { %v2033_v62 = vpop.eup %2032  ;;  %v1149_v30 = vpop.f32.mrf.mxu1 }
 0x2e6   : > { %1179 = vst.msk [vmem:[%s2885_s13 + $0x28] sm:$0xff] %vm977_vm15, %v1171_v50  ;;  %v1170_v25 = vmul.f32 %v2033_v62, %v2015_v15  ;;  %2036 = vrcp.f32 %v1149_v30  ;;  %v1542_v62 = vmul.f32 0.2, %v2690_v35 }
 0x2e7   : > { %v2899_v61 = vpop.f32.mrf.mxu1 }
 0x2e8   : > { %1178 = vst.msk [vmem:[%s2885_s13 + $0x20] sm:$0xff] %vm977_vm15, %v1170_v25  ;;  %v1434_v32 = vmul.f32 0.2, %v2899_v61 }
 0x2e9   : > { %v2904_v20 = vpop.f32.mrf.mxu1 }
 0x2ea   : > { %v1443_v4 = vmul.f32 1.442695, %v1434_v32  ;;  %v1433_v49 = vmul.f32 0.2, %v2904_v20  ;;  %v1549_v32 = vmul.f32 1.442695, %v1539_v52 }
 0x2eb   : > { %v2907_v36 = vpop.f32.mrf.mxu1 }
 0x2ec   : > { %2038 = vpow2.f32 %v1443_v4  ;;  %v1441_v23 = vmul.f32 1.442695, %v1433_v49  ;;  %v1436_v34 = vmul.f32 0.2, %v2907_v36  ;;  %v1541_v4 = vmul.f32 0.2, %v2680_v19 }
 0x2ed   : > { %v2910_v13 = vpop.f32.mrf.mxu1 }
 0x2ee   : > { %2040 = vpow2.f32 %v1441_v23  ;;  %v1447_v15 = vmul.f32 1.442695, %v1436_v34  ;;  %v1435_v28 = vmul.f32 0.2, %v2910_v13  ;;  %v1553_v7 = vmul.f32 1.442695, %v1541_v4 }
 0x2ef   : > { %v2913_v44 = vpop.f32.mrf.mxu1 }
 0x2f0   : > { %2042 = vpow2.f32 %v1447_v15  ;;  %v1445_v46 = vmul.f32 1.442695, %v1435_v28  ;;  %v1438_v53 = vmul.f32 0.2, %v2913_v44  ;;  %v1555_v15 = vmul.f32 1.442695, %v1542_v62 }
 0x2f1   : > { %v2035_v55 = vpop.eup %2034  ;;  %v2917_v42 = vpop.f32.mrf.mxu1  ;;  %v1544_v28 = vmul.f32 0.2, %v2701_v54 }
 0x2f2   : > { %v1173_v56 = vmul.f32 %v2035_v55, %v2867_v29  ;;  %2044 = vpow2.f32 %v1445_v46  ;;  %v1451_v57 = vmul.f32 1.442695, %v1438_v53  ;;  %v1437_v8 = vmul.f32 0.2, %v2917_v42 }
 0x2f3   : > { %v2037_v14 = vpop.eup %2036  ;;  %v2922_v18 = vpop.f32.mrf.mxu1  ;;  %v1540_v29 = vmul.f32 0.2, %v2676_v9  ;;  %v1559_v10 = vmul.f32 1.442695, %v1544_v28 }
 0x2f4   : > { %1181 = vst.msk [vmem:[%s2885_s13 + $0x38] sm:$0xff] %vm977_vm15, %v1173_v56  ;;  %v1172_v21 = vmul.f32 %v2037_v14, %v2863_v51  ;;  %2046 = vpow2.f32 %v1451_v57  ;;  %v1449_v22 = vmul.f32 1.442695, %v1437_v8  ;;  %v1440_v27 = vmul.f32 0.2, %v2922_v18 }
 0x2f5   : > { %v2929_v12 = vpop.f32.mrf.mxu1  ;;  %v1551_v50 = vmul.f32 1.442695, %v1540_v29  ;;  %v1543_v56 = vmul.f32 0.2, %v2697_v24 }
 0x2f6   : > { %1180 = vst.msk [vmem:[%s2885_s13 + $0x30] sm:$0xff] %vm977_vm15, %v1172_v21  ;;  %2048 = vpow2.f32 %v1449_v22  ;;  %v1455_v11 = vmul.f32 1.442695, %v1440_v27  ;;  %v1439_v17 = vmul.f32 0.2, %v2929_v12  ;;  %vm3145_vm15 = vmmov %vm3142_vm0 }
 0x2f7   : > { %v1557_v29 = vmul.f32 1.442695, %v1543_v56 }
 0x2f8   : > { %2050 = vpow2.f32 %v1455_v11  ;;  %v1453_v51 = vmul.f32 1.442695, %v1439_v17 }
 0x2f9   : > { %v2039_v40 = vpop.eup %2038  ;;  %2052 = vpow2.f32 %v1547_v16  ;;  %v2946_v16 = vpop.permute.xlu0 %1363 }
 0x2fa   : > { %2054 = vpow2.f32 %v1453_v51  ;;  %v1458_v30 = vmul.f32 0.5, %v2039_v40 }
 0x2fb   : > { %v2041_v25 = vpop.eup %2040  ;;  %2056 = vpow2.f32 %v1545_v38  ;;  %v2950_v38 = vpop.permute.xlu1 %1361 }
 0x2fc   : > { %v1466_v49 = vmul.f32 %v1458_v30, %v2728_v47  ;;  %v1457_v23 = vmul.f32 0.5, %v2041_v25  ;;  %2058 = vpow2.f32 %v1551_v50 }
 0x2fd   : > { %v2043_v34 = vpop.eup %2042  ;;  %2060 = vpow2.f32 %v1549_v32  ;;  %v1368_v4 = vpop.permute.xlu0 %1367 }
 0x2fe   : > { %1483 = vrot.lane.b32.xlu0 %v1466_v49, %s2087_s16  ;;  %v1465_v46 = vmul.f32 %v1457_v23, %v2735_v1  ;;  %v1460_v53 = vmul.f32 0.5, %v2043_v34  ;;  %2062 = vpow2.f32 %v1555_v15 }
 0x2ff   : > { %v2045_v55 = vpop.eup %2044  ;;  %2064 = vpow2.f32 %v1553_v7  ;;  %v1366_v15 = vpop.permute.xlu1 %1365 }
 0x300   : > { %1481 = vrot.lane.b32.xlu1 %v1465_v46, %s2087_s16  ;;  %v1468_v57 = vmul.f32 %v1460_v53, %v2742_v45  ;;  %v1459_v8 = vmul.f32 0.5, %v2045_v55  ;;  %2066 = vpow2.f32 %v1559_v10 }
 0x301   : > { %v2047_v14 = vpop.eup %2046  ;;  %2068 = vpow2.f32 %v1557_v29 }
 0x302   : > { %1487 = vrot.lane.b32.xlu0 %v1468_v57, %s2087_s16  ;;  %v1467_v21 = vmul.f32 %v1459_v8, %v2749_v60  ;;  %v1462_v22 = vmul.f32 0.5, %v2047_v14  ;;  %v1372_v57 = vpop.permute.xlu0 %1371 }
 0x303   : > { %v2049_v27 = vpop.eup %2048 }
 0x304   : > { %1485 = vrot.lane.b32.xlu1 %v1467_v21, %s2087_s16  ;;  %v1470_v11 = vmul.f32 %v1462_v22, %v2756_v6  ;;  %v1461_v17 = vmul.f32 0.5, %v2049_v27  ;;  %v1370_v21 = vpop.permute.xlu1 %1369 }
 0x305   : > { %v2051_v52 = vpop.eup %2050 }
 0x306   : > { %v2053_v51 = vpop.eup %2052  ;;  %1491 = vrot.lane.b32.xlu0 %v1470_v11, %s2087_s16  ;;  %v1469_v40 = vmul.f32 %v1461_v17, %v2763_v39  ;;  %v1464_v50 = vmul.f32 0.5, %v2051_v52 }
 0x307   : > { %v2055_v62 = vpop.eup %2054  ;;  %v1562_v23 = vmul.f32 0.5, %v2053_v51  ;;  %v1376_v51 = vpop.permute.xlu0 %1375 }
 0x308   : > { %v1463_v30 = vmul.f32 0.5, %v2055_v62  ;;  %1489 = vrot.lane.b32.xlu1 %v1469_v40, %s2087_s16  ;;  %v1472_v25 = vmul.f32 %v1464_v50, %v2770_v31  ;;  %v2057_v32 = vpop.eup %2056  ;;  %v1374_v62 = vpop.permute.xlu1 %1373 }
 0x309   : > { %v2059_v49 = vpop.eup %2058  ;;  %v1570_v46 = vmul.f32 %v1562_v23, %v2946_v16  ;;  %v1561_v53 = vmul.f32 0.5, %v2057_v32 }
 0x30a   : > { %1495 = vrot.lane.b32.xlu0 %v1472_v25, %s2087_s16  ;;  %v1471_v34 = vmul.f32 %v1463_v30, %v2777_v26  ;;  %v2061_v28 = vpop.eup %2060  ;;  %v1564_v55 = vmul.f32 0.5, %v2059_v49 }
 0x30b   : > { %v1569_v7 = vmul.f32 %v1561_v53, %v2950_v38  ;;  %v2063_v56 = vpop.eup %2062  ;;  %v1563_v14 = vmul.f32 0.5, %v2061_v28  ;;  %v1404_v49 = vpop.permute.xlu0 %1403 }
 0x30c   : > { %1493 = vrot.lane.b32.xlu1 %v1471_v34, %s2087_s16  ;;  %v1572_v8 = vmul.f32 %v1564_v55, %v1368_v4  ;;  %v2065_v10 = vpop.eup %2064  ;;  %v1566_v22 = vmul.f32 0.5, %v2063_v56  ;;  %v1402_v23 = vpop.permute.xlu1 %1401  ;;  %v1346_v55 = vmul.f32 0.1, %v2668_v48  ;;  %v1350_v48 = vmul.f32 0.1, %v2690_v35 }
 0x30d   : > { %v1571_v27 = vmul.f32 %v1563_v14, %v1366_v15  ;;  %v2067_v29 = vpop.eup %2066  ;;  %v1565_v17 = vmul.f32 0.5, %v2065_v10  ;;  %v1348_v10 = vmul.f32 0.1, %v2676_v9  ;;  %v1349_v9 = vmul.f32 0.1, %v2680_v19 }
 0x30e   : > { %1587 = vrot.lane.b32.xlu0 %v1570_v46, %s2086_s9  ;;  %v1574_v11 = vmul.f32 %v1566_v22, %v1372_v57  ;;  %v2069_v52 = vpop.eup %2068  ;;  %v1568_v40 = vmul.f32 0.5, %v2067_v29  ;;  %v1386_v56 = vmul.f32 %v2946_v16, %v1346_v55 }
 0x30f   : > { %v1573_v50 = vmul.f32 %v1565_v17, %v1370_v21  ;;  %v1567_v25 = vmul.f32 0.5, %v2069_v52  ;;  %v1408_v34 = vpop.permute.xlu0 %1407  ;;  %v1347_v17 = vmul.f32 0.1, %v2672_v33  ;;  %v1352_v33 = vmul.f32 0.1, %v2701_v54 }
 0x310   : > { %1585 = vrot.lane.b32.xlu1 %v1569_v7, %s2086_s9  ;;  %v1576_v30 = vmul.f32 %v1568_v40, %v1376_v51  ;;  %v1406_v28 = vpop.permute.xlu1 %1405 }
 0x311   : > { %v1575_v32 = vmul.f32 %v1567_v25, %v1374_v62 }
 0x312   : > { %1591 = vrot.lane.b32.xlu0 %v1572_v8, %s2086_s9  ;;  %v1345_v8 = vmul.f32 0.1, %v2664_v43 }
 0x313   : > { %v1412_v46 = vpop.permute.xlu0 %1411 }
 0x314   : > { %1589 = vrot.lane.b32.xlu1 %v1571_v27, %s2086_s9  ;;  %v1410_v53 = vpop.permute.xlu1 %1409  ;;  %v1385_v22 = vmul.f32 %v2950_v38, %v1345_v8  ;;  %v1426_v27 = vadd.f32 %v1404_v49, %v1386_v56 }
 0x316   : > { %1595 = vrot.lane.b32.xlu0 %v1574_v11, %s2086_s9  ;;  %v1388_v11 = vmul.f32 %v1368_v4, %v1348_v10  ;;  %v1425_v52 = vadd.f32 %v1402_v23, %v1385_v22  ;;  %v1389_v23 = vmul.f32 %v1370_v21, %v1349_v9 }
 0x317   : > { %v1416_v7 = vpop.permute.xlu0 %1415 }
 0x318   : > { %1593 = vrot.lane.b32.xlu1 %v1573_v50, %s2086_s9  ;;  %v1414_v14 = vpop.permute.xlu1 %1413  ;;  %v1428_v25 = vadd.f32 %v1408_v34, %v1388_v11  ;;  %v1351_v34 = vmul.f32 0.1, %v2697_v24  ;;  %v1429_v8 = vadd.f32 %v1410_v53, %v1389_v23 }
 0x31a   : > { %1599 = vrot.lane.b32.xlu0 %v1576_v30, %s2086_s9  ;;  %v1387_v30 = vmul.f32 %v1366_v15, %v1347_v17  ;;  %v1392_v15 = vmul.f32 %v1376_v51, %v1352_v33  ;;  %v1618_v17 = vand.u32 127, %v319_v0 }
 0x31c   : > { %1597 = vrot.lane.b32.xlu1 %v1575_v32, %s2086_s9  ;;  %v1390_v32 = vmul.f32 %v1372_v57, %v1350_v48  ;;  %v1427_v38 = vadd.f32 %v1406_v28, %v1387_v30  ;;  %v1391_v28 = vmul.f32 %v1374_v62, %v1351_v34  ;;  %v1432_v10 = vadd.f32 %v1416_v7, %v1392_v15 }
 0x31d   : > { %v1514_v62 = vmul.f32 0.1, %v2899_v61  ;;  %v1515_v48 = vmul.f32 0.1, %v2910_v13  ;;  %v1623_v30 = vand.u32 3, %v1618_v17 }
 0x31e   : > { %v1430_v55 = vadd.f32 %v1412_v46, %v1390_v32  ;;  %v1431_v21 = vadd.f32 %v1414_v14, %v1391_v28  ;;  %v1513_v14 = vmul.f32 0.1, %v2904_v20  ;;  %v1518_v61 = vmul.f32 0.1, %v2913_v44 }
 0x31f   : > { %v1523_v20 = vmul.f32 %v1515_v48, %v2749_v60  ;;  %vm2998_vm4 = vcmp.lt.s32.totalorder %v1623_v30, 2 }
 0x320   : > { %v1526_v60 = vmul.f32 %v1518_v61, %v2756_v6 }
 0x370   : > { %v1484_v29 = vpop.permute.xlu0 %1483 }
 0x371   : > { %v1506_v40 = vsub.f32 %v1426_v27, %v1484_v29 }
 0x372   : > { %v1482_v50 = vpop.permute.xlu1 %1481 }
 0x373   : > { %v1505_v16 = vsub.f32 %v1425_v52, %v1482_v50  ;;  %1642 = vrot.lane.b32.xlu0 %v1506_v40, %s2086_s9  ;;  %v1516_v52 = vmul.f32 0.1, %v2907_v36  ;;  %v1522_v50 = vmul.f32 %v1514_v62, %v2728_v47  ;;  %v1517_v47 = vmul.f32 0.1, %v2917_v42 }
 0x374   : > { %v1488_v43 = vpop.permute.xlu0 %1487  ;;  %v1531_v42 = vadd.f32 %v1523_v20, %v2805_v58  ;;  %v1534_v58 = vadd.f32 %v1526_v60, %v2812_v5 }
 0x375   : > { %v1508_v49 = vsub.f32 %v1428_v25, %v1488_v43  ;;  %1640 = vrot.lane.b32.xlu1 %v1505_v16, %s2086_s9  ;;  %v1521_v25 = vmul.f32 %v1513_v14, %v2735_v1  ;;  %v1524_v16 = vmul.f32 %v1516_v52, %v2742_v45  ;;  %v1530_v0 = vadd.f32 %v1522_v50, %v2784_v41 }
 0x376   : > { %v1486_v4 = vpop.permute.xlu1 %1485  ;;  %v1520_v41 = vmul.f32 0.1, %v2922_v18 }
 0x377   : > { %v1507_v56 = vsub.f32 %v1427_v38, %v1486_v4  ;;  %1646 = vrot.lane.b32.xlu0 %v1508_v49, %s2086_s9  ;;  %v1529_v9 = vadd.f32 %v1521_v25, %v2791_v2  ;;  %v1532_v1 = vadd.f32 %v1524_v16, %v2798_v59  ;;  %v1525_v49 = vmul.f32 %v1517_v47, %v2763_v39 }
 0x378   : > { %v1492_v35 = vpop.permute.xlu0 %1491  ;;  %v1519_v59 = vmul.f32 0.1, %v2929_v12  ;;  %v1528_v33 = vmul.f32 %v1520_v41, %v2770_v31 }
 0x379   : > { %v1510_v57 = vsub.f32 %v1430_v55, %v1492_v35  ;;  %1644 = vrot.lane.b32.xlu1 %v1507_v56, %s2086_s9  ;;  %v1533_v35 = vadd.f32 %v1525_v49, %v2819_v3 }
 0x37a   : > { %v1490_v19 = vpop.permute.xlu1 %1489  ;;  %v1527_v12 = vmul.f32 %v1519_v59, %v2777_v26  ;;  %v1536_v34 = vadd.f32 %v1528_v33, %v2826_v63 }
 0x37b   : > { %v1509_v22 = vsub.f32 %v1429_v8, %v1490_v19  ;;  %1650 = vrot.lane.b32.xlu0 %v1510_v57, %s2086_s9 }
 0x37c   : > { %v1496_v54 = vpop.permute.xlu0 %1495  ;;  %v1535_v3 = vadd.f32 %v1527_v12, %v2833_v37 }
 0x37d   : > { %v1512_v46 = vsub.f32 %v1432_v10, %v1496_v54  ;;  %1648 = vrot.lane.b32.xlu1 %v1509_v22, %s2086_s9 }
 0x37e   : > { %v1494_v27 = vpop.permute.xlu1 %1493 }
 0x37f   : > { %v1511_v29 = vsub.f32 %v1431_v21, %v1494_v27  ;;  %1654 = vrot.lane.b32.xlu0 %v1512_v46, %s2086_s9 }
 0x380   : > { %v1588_v24 = vpop.permute.xlu0 %1587 }
 0x381   : > { %1652 = vrot.lane.b32.xlu1 %v1511_v29, %s2086_s9  ;;  %v1610_v13 = vadd.f32 %v1588_v24, %v1530_v0 }
 0x382   : > { %v1586_v51 = vpop.permute.xlu1 %1585 }
 0x383   : > { %v1609_v44 = vadd.f32 %v1586_v51, %v1529_v9 }
 0x384   : > { %v1592_v53 = vpop.permute.xlu0 %1591 }
 0x385   : > { %v1612_v4 = vadd.f32 %v1592_v53, %v1532_v1 }
 0x386   : > { %v1590_v11 = vpop.permute.xlu1 %1589 }
 0x387   : > { %v1611_v23 = vadd.f32 %v1590_v11, %v1531_v42 }
 0x388   : > { %v1596_v7 = vpop.permute.xlu0 %1595 }
 0x389   : > { %v1614_v56 = vadd.f32 %v1596_v7, %v1534_v58 }
 0x38a   : > { %v1594_v40 = vpop.permute.xlu1 %1593 }
 0x38b   : > { %v1613_v5 = vadd.f32 %v1594_v40, %v1533_v35 }
 0x38c   : > { %v1600_v43 = vpop.permute.xlu0 %1599 }
 0x38d   : > { %v1616_v57 = vadd.f32 %v1600_v43, %v1536_v34 }
 0x38e   : > { %v1598_v32 = vpop.permute.xlu1 %1597 }
 0x38f   : > { %v1615_v10 = vadd.f32 %v1598_v32, %v1535_v3 }
 0x3e5   : > { %v1643_v45 = vpop.permute.xlu0 %1642 }
 0x3e6   : > { %v1665_v2 = vsel %vm2998_vm4, %v1643_v45, %v1610_v13 }
 0x3e7   : > { %1673 = vst.msk [vmem:[%s3009_s14 + $0x8] sm:$0xff] %vm3139_vm11, %v1665_v2  ;;  %v1641_v38 = vpop.permute.xlu1 %1640 }
 0x3e8   : > { %v1664_v6 = vsel %vm2998_vm4, %v1641_v38, %v1609_v44 }
 0x3e9   : > { %1672 = vst.msk [vmem:[%s3009_s14] sm:$0xff] %vm3140_vm5, %v1664_v6  ;;  %v1647_v18 = vpop.permute.xlu0 %1646 }
 0x3ea   : > { %v1667_v55 = vsel %vm2998_vm4, %v1647_v18, %v1612_v4 }
 0x3eb   : > { %1675 = vst.msk [vmem:[%s3009_s14 + $0x18] sm:$0xff] %vm3141_vm12, %v1667_v55  ;;  %v1645_v39 = vpop.permute.xlu1 %1644 }
 0x3ec   : > { %v1666_v15 = vsel %vm2998_vm4, %v1645_v39, %v1611_v23 }
 0x3ed   : > { %1674 = vst.msk [vmem:[%s3009_s14 + $0x10] sm:$0xff] %vm3142_vm0, %v1666_v15  ;;  %v1651_v31 = vpop.permute.xlu0 %1650 }
 0x3ee   : > { %v1669_v8 = vsel %vm2998_vm4, %v1651_v31, %v1614_v56 }
 0x3ef   : > { %1677 = vst.msk [vmem:[%s3009_s14 + $0x28] sm:$0xff] %vm3143_vm9, %v1669_v8  ;;  %v1649_v26 = vpop.permute.xlu1 %1648 }
 0x3f0   : > { %v1668_v19 = vsel %vm2998_vm4, %v1649_v26, %v1613_v5 }
 0x3f1   : > { %1676 = vst.msk [vmem:[%s3009_s14 + $0x20] sm:$0xff] %vm3144_vm8, %v1668_v19  ;;  %v1655_v28 = vpop.permute.xlu0 %1654 }
 0x3f2   : > { %v1671_v22 = vsel %vm2998_vm4, %v1655_v28, %v1616_v57 }
 0x3f3   : > { %1679 = vst.msk [vmem:[%s3009_s14 + $0x38] sm:$0xff] %vm3145_vm15, %v1671_v22  ;;  %v1653_v63 = vpop.permute.xlu1 %1652 }
 0x3f4   : > { %v1670_v54 = vsel %vm2998_vm4, %v1653_v63, %v1615_v10 }
 0x3f5   : > { %1678 = vst.msk [vmem:[%s3009_s14 + $0x30] sm:$0xff] %vm3146_vm13, %v1670_v54 }
 0x3f6 PF: > { %s19_s27 = sadd.s32 1, %s2076_s27  }
 0x3f7   : > { %p16_p4 = scmp.ge.s32.totalorder %s19_s27, 4  }
 0x3f9   :  { %18 = sbr.rel (!%p16_p4) target bundleno = 1 (0x1), region = 90 }

</bundles_post_ra>
